<compile_context>
chip_gen: v6e
topology: v6e:2x2x1
jax: 0.10.0
libtpu: 0.0.40
codegen_flags: <defaults>
</compile_context>

<pallas_src>
import jax
import jax.numpy as jnp
from jax import lax
from jax.experimental import pallas as pl
from jax.experimental.pallas import tpu as pltpu


def _round_up(n, m):
    return ((n + m - 1) // m) * m


def _ae_kernel(x_ref, w_enc_ref, b_enc_ref, w_dec_ref, b_dec_ref,
               pre_ref, lat_ref, rec_ref,
               xn_sc, mu_sc, std_sc, acc_sc):
    """One (batch-tile i, latent-chunk k) grid step.

    k == 0   : normalize the x tile once, cache x_n / mu / std, zero decoder acc.
    every k  : encoder chunk matmul -> pre/lat chunk, decoder partial matmul
               accumulated into acc_sc.
    k == last: recons = (acc + b_dec_eff) * std + mu.
    """
    k = pl.program_id(1)

    @pl.when(k == 0)
    def _init():
        x = x_ref[...].astype(jnp.float32)
        mu = jnp.mean(x, axis=-1, keepdims=True)
        xc = x - mu
        var = jnp.mean(xc * xc, axis=-1, keepdims=True)
        mu_sc[...] = mu
        std_sc[...] = jnp.sqrt(var + 1e-9)
        xn_sc[...] = xc * lax.rsqrt(var + 1e-9)     # EUP rsqrt; VALU slot freed
        acc_sc[...] = jnp.zeros_like(acc_sc)

    xn = xn_sc[...]

    # Encoder chunk: (tm, n_inputs) @ (n_inputs, tn) on the MXU, f32 accumulate.
    # pre_bias is already folded into b_enc_eff by the wrapper.
    pre = jnp.dot(xn.astype(w_enc_ref.dtype), w_enc_ref[...],
                  preferred_element_type=jnp.float32)
    pre = pre + b_enc_ref[...].astype(jnp.float32)

    # Activation = ReLU.
    lat = jnp.maximum(pre, 0.0)

    # Decoder partial contraction: (tm, tn) @ (tn, n_inputs), f32 accumulation
    # across the latent-chunk grid axis.
    acc_sc[...] += jnp.dot(lat.astype(w_dec_ref.dtype), w_dec_ref[...],
                           preferred_element_type=jnp.float32)

    pre_ref[...] = pre.astype(pre_ref.dtype)
    lat_ref[...] = lat.astype(lat_ref.dtype)

    @pl.when(k == pl.num_programs(1) - 1)
    def _finalize():
        rec = (acc_sc[...] + b_dec_ref[...].astype(jnp.float32)) * std_sc[...] + mu_sc[...]
        rec_ref[...] = rec.astype(rec_ref.dtype)


def _vmem_bytes_needed(tm, tn, n_inputs, x_bytes, w_bytes, lat_bytes, rec_bytes):
    """Rough VMEM footprint: double-buffered pipeline tiles + scratch."""
    def tile(r, c, b):
        return _round_up(r, 8) * _round_up(c, 128) * b
    need = 0
    need += 2 * tile(tm, n_inputs, x_bytes)         # x tile
    need += 2 * tile(n_inputs, tn, w_bytes)         # w_enc chunk
    need += 2 * tile(1, tn, 4)                      # b_enc chunk
    need += 2 * tile(tn, n_inputs, w_bytes)         # w_dec chunk
    need += 2 * tile(1, n_inputs, 4)                # b_dec_eff
    need += 2 * 2 * tile(tm, tn, lat_bytes)         # pre + lat out tiles
    need += 2 * tile(tm, n_inputs, rec_bytes)       # rec out tile
    need += 2 * tile(tm, n_inputs, 4)               # xn + acc scratch
    need += 2 * tile(tm, 1, 4)                      # mu + std scratch
    return need


def autoencoder_forward(x, pre_bias, w_enc, b_enc, w_dec, b_dec, *,
                        tm=None, tn=512,
                        weights_dtype=None, latent_dtype=None,
                        vmem_limit_bytes=None):
    """Fused SAE forward.

    x: (B, n_inputs).  w_enc: (n_inputs, n_latents), w_dec: (n_latents, n_inputs)
    (i.e. pre-transposed nn.Linear weights).  Returns (latents_pre_act, latents,
    recons).

    weights_dtype=jnp.bfloat16 runs the MXU matmuls in bf16 (f32 accumulation).
    latent_dtype controls the dtype of the two (B, n_latents) outputs.
    """
    B, n_inputs = x.shape
    n_latents = w_enc.shape[1]

    # --- tile selection -----------------------------------------------------
    # Keep the grid deep enough that DMA overlaps compute even after megacore
    # sharding (>= ~4 steps/core); only go to tm=256 for large batches.
    if tm is None:
        tm = 256 if B >= 2048 else 128
    tm = min(tm, _round_up(B, 8))
    tm = _round_up(tm, 8)
    B_pad = _round_up(B, tm)

    tn = max(128, min(tn, _round_up(n_latents, 128)))
    tn = _round_up(tn, 128)
    n_lat_pad = _round_up(n_latents, tn)

    # --- constant-bias folding (done once per call, in f32) ------------------
    #   (x_n - pre_bias) @ W_enc + b_enc  ==  x_n @ W_enc + (b_enc - pre_bias @ W_enc)
    #   (lat @ W_dec + b_dec + pre_bias)  ==  lat @ W_dec + (b_dec + pre_bias)
    b_enc_eff = b_enc.astype(jnp.float32) - pre_bias.astype(jnp.float32) @ w_enc.astype(jnp.float32)
    b_dec_eff = b_dec.astype(jnp.float32) + pre_bias.astype(jnp.float32)

    # --- padding (batch tile / latent chunk) ---------------------------------
    x_pad = jnp.pad(x, ((0, B_pad - B), (0, 0))) if B_pad != B else x
    if n_lat_pad != n_latents:
        w_enc = jnp.pad(w_enc, ((0, 0), (0, n_lat_pad - n_latents)))
        w_dec = jnp.pad(w_dec, ((0, n_lat_pad - n_latents), (0, 0)))
        b_enc_eff = jnp.pad(b_enc_eff, ((0, n_lat_pad - n_latents),))

    # --- optional bf16 weights for native-bf16 MXU throughput ----------------
    if weights_dtype is not None:
        w_enc = w_enc.astype(weights_dtype)
        w_dec = w_dec.astype(weights_dtype)

    b_enc_2d = b_enc_eff.reshape(1, n_lat_pad)
    b_dec_2d = b_dec_eff.reshape(1, n_inputs)

    lat_dt = jnp.float32 if latent_dtype is None else latent_dtype
    rec_dt = jnp.float32

    # --- VMEM budget (v7x has only 64 MiB physical; default tiles stay well
    # under that, so clamp the scoped limit accordingly) -----------------------
    if vmem_limit_bytes is None:
        need = _vmem_bytes_needed(
            tm, tn, n_inputs,
            x_bytes=jnp.dtype(x.dtype).itemsize,
            w_bytes=jnp.dtype(w_enc.dtype).itemsize,
            lat_bytes=jnp.dtype(lat_dt).itemsize,
            rec_bytes=jnp.dtype(rec_dt).itemsize)
        vmem_limit_bytes = min(max(int(need * 1.5) + (4 << 20), 32 << 20), 96 << 20)

    out_shapes = (
        jax.ShapeDtypeStruct((B_pad, n_lat_pad), lat_dt),   # latents_pre_act
        jax.ShapeDtypeStruct((B_pad, n_lat_pad), lat_dt),   # latents
        jax.ShapeDtypeStruct((B_pad, n_inputs), rec_dt),    # recons
    )

    grid = (B_pad // tm, n_lat_pad // tn)

    pre, lat, rec = pl.pallas_call(
        _ae_kernel,
        out_shape=out_shapes,
        grid_spec=pltpu.PrefetchScalarGridSpec(
            num_scalar_prefetch=0,
            grid=grid,
            in_specs=[
                pl.BlockSpec((tm, n_inputs), lambda i, k: (i, 0)),     # x tile
                pl.BlockSpec((n_inputs, tn), lambda i, k: (0, k)),     # W_enc chunk
                pl.BlockSpec((1, tn), lambda i, k: (0, k)),            # b_enc_eff chunk
                pl.BlockSpec((tn, n_inputs), lambda i, k: (k, 0)),     # W_dec chunk
                pl.BlockSpec((1, n_inputs), lambda i, k: (0, 0)),      # b_dec_eff
            ],
            out_specs=[
                pl.BlockSpec((tm, tn), lambda i, k: (i, k)),           # pre
                pl.BlockSpec((tm, tn), lambda i, k: (i, k)),           # lat
                pl.BlockSpec((tm, n_inputs), lambda i, k: (i, 0)),     # rec (acc output)
            ],
            scratch_shapes=[
                pltpu.VMEM((tm, n_inputs), jnp.float32),               # x_n cache
                pltpu.VMEM((tm, 1), jnp.float32),                      # mu
                pltpu.VMEM((tm, 1), jnp.float32),                      # std
                pltpu.VMEM((tm, n_inputs), jnp.float32),               # decoder acc
            ]),
        compiler_params=pltpu.CompilerParams(
            dimension_semantics=("parallel", "arbitrary"),
            vmem_limit_bytes=vmem_limit_bytes),
    )(x_pad, w_enc, b_enc_2d, w_dec, b_dec_2d)

    if B_pad != B:
        pre, lat, rec = pre[:B], lat[:B], rec[:B]
    if n_lat_pad != n_latents:
        pre, lat = pre[:, :n_latents], lat[:, :n_latents]
    return pre, lat, rec


def _reference_forward(x, pre_bias, w_enc, b_enc, w_dec, b_dec):
    mu = jnp.mean(x, axis=-1, keepdims=True)
    var = jnp.mean((x - mu) ** 2, axis=-1, keepdims=True)
    std = jnp.sqrt(var + 1e-9)
    x_n = (x - mu) / std
    pre = (x_n - pre_bias) @ w_enc + b_enc
    lat = jnp.maximum(pre, 0.0)
    rec = (lat @ w_dec + b_dec + pre_bias) * std + mu
    return pre, lat, rec


if __name__ == "__main__":
    # Small but representative shapes: feature dims are multiples of 128 so
    # every output tile is lane-dense (unmasked vst).
    B = 384          # -> 3 batch tiles with tm=128
    n_inputs = 256
    n_latents = 512

    key = jax.random.PRNGKey(0)
    kx, k1, k2, k3, k4, k5 = jax.random.split(key, 6)

    x = jax.random.normal(kx, (B, n_inputs), dtype=jnp.float32)
    pre_bias = 0.01 * jax.random.normal(k1, (n_inputs,), dtype=jnp.float32)
    w_enc = jax.random.normal(k2, (n_inputs, n_latents), dtype=jnp.float32) / jnp.sqrt(n_inputs)
    b_enc = 0.01 * jax.random.normal(k3, (n_latents,), dtype=jnp.float32)
    w_dec = jax.random.normal(k4, (n_latents, n_inputs), dtype=jnp.float32) / jnp.sqrt(n_latents)
    b_dec = 0.01 * jax.random.normal(k5, (n_inputs,), dtype=jnp.float32)

    pre_r, lat_r, rec_r = _reference_forward(x, pre_bias, w_enc, b_enc, w_dec, b_dec)

    # 1) f32 validation path; tn=256 forces 2 latent chunks so the decoder
    #    accumulation / finalize path is exercised.
    pre, lat, rec = autoencoder_forward(x, pre_bias, w_enc, b_enc, w_dec, b_dec, tn=256)
    jax.block_until_ready((pre, lat, rec))
    assert jnp.allclose(pre, pre_r, atol=2e-4, rtol=2e-4), "latents_pre_act mismatch"
    assert jnp.allclose(lat, lat_r, atol=2e-4, rtol=2e-4), "latents mismatch"
    assert jnp.allclose(rec, rec_r, atol=2e-3, rtol=2e-3), "recons mismatch"

    # 2) Production path: bf16 weights on the MXU (f32 accumulation) + bf16
    #    pre/lat outputs to cut latent HBM write traffic.  Looser tolerance.
    pre_b, lat_b, rec_b = autoencoder_forward(
        x, pre_bias, w_enc, b_enc, w_dec, b_dec,
        weights_dtype=jnp.bfloat16, latent_dtype=jnp.bfloat16)
    jax.block_until_ready((pre_b, lat_b, rec_b))
    assert pre_b.dtype == jnp.bfloat16 and rec_b.dtype == jnp.float32
    assert jnp.mean(jnp.abs(rec_b - rec_r)) < 5e-2, "bf16 recons drifted too far"
    assert jnp.mean(jnp.abs(pre_b.astype(jnp.float32) - pre_r)) < 5e-2, "bf16 pre drifted"

    # 3) Batch that is NOT a multiple of the tile (padding / small-tm path).
    pre2, lat2, rec2 = autoencoder_forward(x[:37], pre_bias, w_enc, b_enc, w_dec, b_dec)
    jax.block_until_ready((pre2, lat2, rec2))
    assert pre2.shape == (37, n_latents) and rec2.shape == (37, n_inputs)
    assert jnp.allclose(rec2, rec_r[:37], atol=2e-3, rtol=2e-3)

    # TODO(synk): JumpReLU activation branch (threshold compare) not implemented;
    # the module's default activation is nn.ReLU, which is what this kernel fuses.
    print("KERNEL_OK")
</pallas_src>

<mosaic_0001>
module attributes {stable_mosaic.version = 11 : i64} {
  func.func @_ae_kernel(%arg0: i32, %arg1: i32, %arg2: memref<128x256xf32, #tpu.memory_space<vmem>>, %arg3: memref<256x256xf32, #tpu.memory_space<vmem>>, %arg4: memref<1x256xf32, #tpu.memory_space<vmem>>, %arg5: memref<256x256xf32, #tpu.memory_space<vmem>>, %arg6: memref<1x256xf32, #tpu.memory_space<vmem>>, %arg7: memref<128x256xf32, #tpu.memory_space<vmem>>, %arg8: memref<128x256xf32, #tpu.memory_space<vmem>>, %arg9: memref<128x256xf32, #tpu.memory_space<vmem>>, %arg10: memref<128x256xf32, #tpu.memory_space<vmem>>, %arg11: memref<128x1xf32, #tpu.memory_space<vmem>>, %arg12: memref<128x1xf32, #tpu.memory_space<vmem>>, %arg13: memref<128x256xf32, #tpu.memory_space<vmem>>) attributes {dimension_semantics = [#tpu.dimension_semantics<parallel>, #tpu.dimension_semantics<arbitrary>], iteration_bounds = array<i64: 3, 2>, scalar_prefetch = 0 : i64, scratch_operands = 4 : i64, tpu.core_type = #tpu.core_type<tc>, window_params = [{transform_indices = @transform_0, window_bounds = array<i64: 128, 256>}, {transform_indices = @transform_1, window_bounds = array<i64: 256, 256>}, {transform_indices = @transform_2, window_bounds = array<i64: 1, 256>}, {transform_indices = @transform_3, window_bounds = array<i64: 256, 256>}, {pipeline_mode = #tpu.pipeline_mode<synchronous>, transform_indices = @transform_4, window_bounds = array<i64: 1, 256>}, {transform_indices = @transform_5, window_bounds = array<i64: 128, 256>}, {transform_indices = @transform_6, window_bounds = array<i64: 128, 256>}, {transform_indices = @transform_7, window_bounds = array<i64: 128, 256>}]} {
    %c0_i32 = arith.constant 0 : i32
    %0 = arith.cmpi eq, %arg1, %c0_i32 : i32
    %1 = arith.extui %0 : i1 to i32
    %c0_i32_0 = arith.constant 0 : i32
    %2 = arith.cmpi ne, %1, %c0_i32_0 : i32
    scf.if %2 {
      %c0_19 = arith.constant 0 : index
      %c0_20 = arith.constant 0 : index
      %21 = vector.load %arg2[%c0_19, %c0_20] : memref<128x256xf32, #tpu.memory_space<vmem>>, vector<128x256xf32>
      %cst_21 = arith.constant dense<0.000000e+00> : vector<128xf32>
      %22 = vector.multi_reduction <add>, %21, %cst_21 [1] : vector<128x256xf32> to vector<128xf32>
      %23 = vector.shape_cast %22 : vector<128xf32> to vector<128x1xf32>
      %cst_22 = arith.constant 2.560000e+02 : f32
      %24 = vector.broadcast %cst_22 : f32 to vector<128x1xf32>
      %25 = arith.divf %23, %24 : vector<128x1xf32>
      %26 = vector.broadcast %25 : vector<128x1xf32> to vector<128x256xf32>
      %27 = arith.subf %21, %26 : vector<128x256xf32>
      %28 = arith.mulf %27, %27 : vector<128x256xf32>
      %cst_23 = arith.constant dense<0.000000e+00> : vector<128xf32>
      %29 = vector.multi_reduction <add>, %28, %cst_23 [1] : vector<128x256xf32> to vector<128xf32>
      %30 = vector.shape_cast %29 : vector<128xf32> to vector<128x1xf32>
      %cst_24 = arith.constant 2.560000e+02 : f32
      %31 = vector.broadcast %cst_24 : f32 to vector<128x1xf32>
      %32 = arith.divf %30, %31 : vector<128x1xf32>
      %c0_25 = arith.constant 0 : index
      %c0_26 = arith.constant 0 : index
      %33 = vector.load %arg11[%c0_25, %c0_26] : memref<128x1xf32, #tpu.memory_space<vmem>>, vector<128x1xf32>
      tpu.vector_store %arg11[%c0_25, %c0_26], %25 {strides = array<i32>} : memref<128x1xf32, #tpu.memory_space<vmem>>, vector<128x1xf32>,
      %cst_27 = arith.constant 9.99999971E-10 : f32
      %34 = vector.broadcast %cst_27 : f32 to vector<128x1xf32>
      %35 = arith.addf %32, %34 : vector<128x1xf32>
      %36 = math.sqrt %35 : vector<128x1xf32>
      %c0_28 = arith.constant 0 : index
      %c0_29 = arith.constant 0 : index
      %37 = vector.load %arg12[%c0_28, %c0_29] : memref<128x1xf32, #tpu.memory_space<vmem>>, vector<128x1xf32>
      tpu.vector_store %arg12[%c0_28, %c0_29], %36 {strides = array<i32>} : memref<128x1xf32, #tpu.memory_space<vmem>>, vector<128x1xf32>,
      %cst_30 = arith.constant 9.99999971E-10 : f32
      %38 = vector.broadcast %cst_30 : f32 to vector<128x1xf32>
      %39 = arith.addf %32, %38 : vector<128x1xf32>
      %40 = math.rsqrt %39 : vector<128x1xf32>
      %41 = vector.broadcast %40 : vector<128x1xf32> to vector<128x256xf32>
      %42 = arith.mulf %27, %41 : vector<128x256xf32>
      %c0_31 = arith.constant 0 : index
      %c0_32 = arith.constant 0 : index
      %43 = vector.load %arg10[%c0_31, %c0_32] : memref<128x256xf32, #tpu.memory_space<vmem>>, vector<128x256xf32>
      tpu.vector_store %arg10[%c0_31, %c0_32], %42 {strides = array<i32>} : memref<128x256xf32, #tpu.memory_space<vmem>>, vector<128x256xf32>,
      %cst_33 = arith.constant 0.000000e+00 : f32
      %44 = vector.broadcast %cst_33 : f32 to vector<128x256xf32>
      %c0_34 = arith.constant 0 : index
      %c0_35 = arith.constant 0 : index
      %45 = vector.load %arg13[%c0_34, %c0_35] : memref<128x256xf32, #tpu.memory_space<vmem>>, vector<128x256xf32>
      tpu.vector_store %arg13[%c0_34, %c0_35], %44 {strides = array<i32>} : memref<128x256xf32, #tpu.memory_space<vmem>>, vector<128x256xf32>,
    } else {
    }
    %c0 = arith.constant 0 : index
    %c0_1 = arith.constant 0 : index
    %3 = vector.load %arg10[%c0, %c0_1] : memref<128x256xf32, #tpu.memory_space<vmem>>, vector<128x256xf32>
    %c0_2 = arith.constant 0 : index
    %c0_3 = arith.constant 0 : index
    %4 = vector.load %arg3[%c0_2, %c0_3] : memref<256x256xf32, #tpu.memory_space<vmem>>, vector<256x256xf32>
    %cst = arith.constant dense<0.000000e+00> : vector<128x256xf32>
    %5 = tpu.matmul %3, %4, %cst {dimension_numbers = #tpu.dot_dimension_numbers<[1], [0], [0], [1], [0, 0, 1, 1], [], []>} : vector<128x256xf32>, vector<256x256xf32>, vector<128x256xf32> -> vector<128x256xf32>
    %c0_4 = arith.constant 0 : index
    %c0_5 = arith.constant 0 : index
    %6 = vector.load %arg4[%c0_4, %c0_5] : memref<1x256xf32, #tpu.memory_space<vmem>>, vector<1x256xf32>
    %7 = vector.broadcast %6 : vector<1x256xf32> to vector<128x256xf32>
    %8 = arith.addf %5, %7 : vector<128x256xf32>
    %cst_6 = arith.constant 0.000000e+00 : f32
    %9 = vector.broadcast %cst_6 : f32 to vector<128x256xf32>
    %10 = arith.maximumf %8, %9 : vector<128x256xf32>
    %c0_7 = arith.constant 0 : index
    %c0_8 = arith.constant 0 : index
    %11 = vector.load %arg13[%c0_7, %c0_8] : memref<128x256xf32, #tpu.memory_space<vmem>>, vector<128x256xf32>
    %c0_9 = arith.constant 0 : index
    %c0_10 = arith.constant 0 : index
    %12 = vector.load %arg5[%c0_9, %c0_10] : memref<256x256xf32, #tpu.memory_space<vmem>>, vector<256x256xf32>
    %cst_11 = arith.constant dense<0.000000e+00> : vector<128x256xf32>
    %13 = tpu.matmul %10, %12, %cst_11 {dimension_numbers = #tpu.dot_dimension_numbers<[1], [0], [0], [1], [0, 0, 1, 1], [], []>} : vector<128x256xf32>, vector<256x256xf32>, vector<128x256xf32> -> vector<128x256xf32>
    %14 = arith.addf %11, %13 : vector<128x256xf32>
    %c0_12 = arith.constant 0 : index
    %c0_13 = arith.constant 0 : index
    %15 = vector.load %arg13[%c0_12, %c0_13] : memref<128x256xf32, #tpu.memory_space<vmem>>, vector<128x256xf32>
    tpu.vector_store %arg13[%c0_12, %c0_13], %14 {strides = array<i32>} : memref<128x256xf32, #tpu.memory_space<vmem>>, vector<128x256xf32>,
    %c0_14 = arith.constant 0 : index
    %c0_15 = arith.constant 0 : index
    %16 = vector.load %arg7[%c0_14, %c0_15] : memref<128x256xf32, #tpu.memory_space<vmem>>, vector<128x256xf32>
    tpu.vector_store %arg7[%c0_14, %c0_15], %8 {strides = array<i32>} : memref<128x256xf32, #tpu.memory_space<vmem>>, vector<128x256xf32>,
    %c0_16 = arith.constant 0 : index
    %c0_17 = arith.constant 0 : index
    %17 = vector.load %arg8[%c0_16, %c0_17] : memref<128x256xf32, #tpu.memory_space<vmem>>, vector<128x256xf32>
    tpu.vector_store %arg8[%c0_16, %c0_17], %10 {strides = array<i32>} : memref<128x256xf32, #tpu.memory_space<vmem>>, vector<128x256xf32>,
    %c1_i32 = arith.constant 1 : i32
    %18 = arith.cmpi eq, %arg1, %c1_i32 : i32
    %19 = arith.extui %18 : i1 to i32
    %c0_i32_18 = arith.constant 0 : i32
    %20 = arith.cmpi ne, %19, %c0_i32_18 : i32
    scf.if %20 {
      %c0_19 = arith.constant 0 : index
      %c0_20 = arith.constant 0 : index
      %21 = vector.load %arg13[%c0_19, %c0_20] : memref<128x256xf32, #tpu.memory_space<vmem>>, vector<128x256xf32>
      %c0_21 = arith.constant 0 : index
      %c0_22 = arith.constant 0 : index
      %22 = vector.load %arg6[%c0_21, %c0_22] : memref<1x256xf32, #tpu.memory_space<vmem>>, vector<1x256xf32>
      %23 = vector.broadcast %22 : vector<1x256xf32> to vector<128x256xf32>
      %24 = arith.addf %21, %23 : vector<128x256xf32>
      %c0_23 = arith.constant 0 : index
      %c0_24 = arith.constant 0 : index
      %25 = vector.load %arg12[%c0_23, %c0_24] : memref<128x1xf32, #tpu.memory_space<vmem>>, vector<128x1xf32>
      %26 = vector.broadcast %25 : vector<128x1xf32> to vector<128x256xf32>
      %27 = arith.mulf %24, %26 : vector<128x256xf32>
      %c0_25 = arith.constant 0 : index
      %c0_26 = arith.constant 0 : index
      %28 = vector.load %arg11[%c0_25, %c0_26] : memref<128x1xf32, #tpu.memory_space<vmem>>, vector<128x1xf32>
      %29 = vector.broadcast %28 : vector<128x1xf32> to vector<128x256xf32>
      %30 = arith.addf %27, %29 : vector<128x256xf32>
      %c0_27 = arith.constant 0 : index
      %c0_28 = arith.constant 0 : index
      %31 = vector.load %arg9[%c0_27, %c0_28] : memref<128x256xf32, #tpu.memory_space<vmem>>, vector<128x256xf32>
      tpu.vector_store %arg9[%c0_27, %c0_28], %30 {strides = array<i32>} : memref<128x256xf32, #tpu.memory_space<vmem>>, vector<128x256xf32>,
    } else {
    }
    return
  }
  func.func @transform_0(%arg0: i32, %arg1: i32) -> (i32, i32) {
    %c0_i32 = arith.constant 0 : i32
    %c0_i32_0 = arith.constant 0 : i32
    return %arg0, %c0_i32 : i32, i32
  }
  func.func @transform_1(%arg0: i32, %arg1: i32) -> (i32, i32) {
    %c0_i32 = arith.constant 0 : i32
    %c0_i32_0 = arith.constant 0 : i32
    return %c0_i32, %arg1 : i32, i32
  }
  func.func @transform_2(%arg0: i32, %arg1: i32) -> (i32, i32) {
    %c0_i32 = arith.constant 0 : i32
    %c0_i32_0 = arith.constant 0 : i32
    return %c0_i32, %arg1 : i32, i32
  }
  func.func @transform_3(%arg0: i32, %arg1: i32) -> (i32, i32) {
    %c0_i32 = arith.constant 0 : i32
    %c0_i32_0 = arith.constant 0 : i32
    return %arg1, %c0_i32 : i32, i32
  }
  func.func @transform_4(%arg0: i32, %arg1: i32) -> (i32, i32) {
    %c0_i32 = arith.constant 0 : i32
    %c0_i32_0 = arith.constant 0 : i32
    %c0_i32_1 = arith.constant 0 : i32
    return %c0_i32, %c0_i32_0 : i32, i32
  }
  func.func @transform_5(%arg0: i32, %arg1: i32) -> (i32, i32) {
    %c0_i32 = arith.constant 0 : i32
    return %arg0, %arg1 : i32, i32
  }
  func.func @transform_6(%arg0: i32, %arg1: i32) -> (i32, i32) {
    %c0_i32 = arith.constant 0 : i32
    return %arg0, %arg1 : i32, i32
  }
  func.func @transform_7(%arg0: i32, %arg1: i32) -> (i32, i32) {
    %c0_i32 = arith.constant 0 : i32
    %c0_i32_0 = arith.constant 0 : i32
    return %arg0, %c0_i32 : i32, i32
  }
}

</mosaic_0001>

<bundles_post_ra>
// kernel: tpu_custom_call.1
= control target key start
LH: loop header
LB: loop body
LE: loop exit
PB: predicated region body
PF: predicated region fallthrough
CT: control target
= control target key end

     0   :  { %s4231_s0 = inlined_call_operand.hbm [shape: f32[384,256], index: 0, kind: input, shape index: {}]   ;;  %s4232_s1 = inlined_call_operand.hbm [shape: f32[256,512], index: 1, kind: input, shape index: {}]   ;;  %s4233_s2 = inlined_call_operand.hbm [shape: f32[1,512], index: 2, kind: input, shape index: {}]   ;;  %s4234_s3 = inlined_call_operand.hbm [shape: f32[512,256], index: 3, kind: input, shape index: {}]   ;;  %s4235_s4 = inlined_call_operand.vmem [shape: f32[1,256], index: 4, kind: input, shape index: {}]   ;;  %s4236_s5 = inlined_call_operand.hbm [shape: f32[384,512], index: 5, kind: output, shape index: {0}]   ;;  %s4237_s6 = inlined_call_operand.hbm [shape: f32[384,512], index: 6, kind: output, shape index: {1}]   ;;  %s4238_s7 = inlined_call_operand.hbm [shape: f32[384,256], index: 7, kind: output, shape index: {2}]  }
   0x1   :  { %4263 = sst [smem:[#allocation39_spill]] %s4231_s0 }
   0x2   :  { %4264 = sst [smem:[#allocation40_spill]] %s4232_s1 }
   0x3   :  { %4265 = sst [smem:[#allocation41_spill]] %s4235_s4 }
   0x4   :  { %4266 = sst [smem:[#allocation42_spill]] %s4236_s5 }
   0x5   :  { %4267 = sst [smem:[#allocation43_spill]] %s4237_s6 }
   0x6   :  { %4268 = sst [smem:[#allocation44_spill]] %s4238_s7 }
   0x7   :  { %13 = vsyncpa [#allocation7], 0 }
   0x8   :  { %15 = vsyncpa [#allocation7 + $0x1], 0 }
   0x9   :  { %16 = vsyncpa [#allocation10], 0 }
   0xa   :  { %18 = vsyncpa [#allocation10 + $0x1], 0 }
   0xb   :  { %19 = vsyncpa [#allocation13], 0 }
   0xc   :  { %21 = vsyncpa [#allocation13 + $0x1], 0 }
   0xd   :  { %22 = vsyncpa [#allocation8], 0 }
   0xe   :  { %24 = vsyncpa [#allocation8 + $0x1], 0 }
   0xf   :  { %25 = vsyncpa [#allocation16], 0 }
  0x10   :  { %27 = vsyncpa [#allocation16 + $0x1], 0  ;;  %s2921_s24 = smov 0   ;;  %s2923_s25 = smov 0  }
  0x11   :  { %s2925_s26 = smov 0   ;;  %s2927_s27 = smov 0  }
  0x12   :  { %s2929_s28 = smov 0   ;;  %s2931_s29 = smov 0  }
  0x13   :  { %s2933_s30 = smov 0   ;;  %s2935_s8 = smov 0  }
  0x14   :  { %s2937_s9 = smov 0   ;;  %s2939_s10 = smov 0  }
  0x15   :  { %s2941_s11 = smov 0   ;;  %s2943_s12 = smov 0  }
  0x16   :  { %s2945_s13 = smov 0   ;;  %s2947_s14 = smov 0  }
  0x17 LB: > { %4269 = sst [smem:[#allocation24_spill]] %s2812_s24  ;;  %p60_p0 = scmp.eq.s32.totalorder %s2864_s14, 0  ;;  %s2864_s14 = sphi %s2947_s14, %s33_s14   ;;  %s2860_s13 = sphi %s2945_s13, %s4341_s13   ;;  %s2856_s12 = sphi %s2943_s12, %s4340_s12   ;;  %s2852_s11 = sphi %s2941_s11, %s4339_s11   ;;  %s2848_s10 = sphi %s2939_s10, %s4338_s10   ;;  %s2844_s9 = sphi %s2937_s9, %s4328_s9   ;;  %s2840_s8 = sphi %s2935_s8, %s4337_s8   ;;  %s2836_s30 = sphi %s2933_s30, %s4336_s30   ;;  %s2832_s29 = sphi %s2931_s29, %s4326_s29   ;;  %s2828_s28 = sphi %s2929_s28, %s4335_s28   ;;  %s2824_s27 = sphi %s2927_s27, %s4334_s27   ;;  %s2820_s26 = sphi %s2925_s26, %s4324_s26   ;;  %s2816_s25 = sphi %s2923_s25, %s4333_s25   ;;  %s2812_s24 = sphi %s2921_s24, %s4332_s24  }
  0x18   : > { %4270 = sst [smem:[#allocation25_spill]] %s2820_s26  ;;  %p85_p1 = scmp.ne.s32.totalorder %s2832_s29, %s2828_s28 }
  0x19   : > { %4271 = sst [smem:[#allocation26_spill]] %s2832_s29  ;;  %p91_p2 = scmp.ne.s32.totalorder %s2828_s28, %s2824_s27 }
  0x1a   : > { %4272 = sst [smem:[#allocation27_spill]] %s2844_s9  ;;  %p4252_p3 = scmp.lt.s32.totalorder %s2864_s14, 6 }
  0x1b   : > { %4273 = sst [smem:[#allocation28_spill]] %s2848_s10  ;;  %p87_p4 = por %p85_p1, %p60_p0 }
  0x1c   : > { %4274 = sst [smem:[#allocation29_spill]] %s2852_s11  ;;  %s295_s16 = sand.u32 1, %s2864_s14  }
  0x1d   : > { %4275 = sst [smem:[#allocation30_spill]] %s2860_s13  ;;  %s3002_s17 = sand.u32 1, %s2832_s29  }
  0x1e   : > { %s4242_s18 = sshll.u32 %s3002_s17, 9  ;;  %s2339_s19 = sshll.u32 %s2856_s12, 8 }
  0x1f   : > { %s4276_s1 = sld [smem:[#allocation40_spill]]  ;;  %s299_s23 = scalar_lea.vmem [#allocation9], %s4242_s18 }
  0x20   : > { %s306_s7 = sshll.u32 %s299_s23, 4  ;;  %p3013_p5 = pnand %p4252_p3, %p87_p4  ;;  %s307_s7 = int_to_ptr.vmem [resolvable:$true] %s306_s7 }
  0x21   : > { %p2311_p6 = scmp.ge.s32.totalorder %s2864_s14, 1  ;;  %s3018_s5 = scalar_lea.sflag [#allocation10], %s295_s16 }
  0x22   : > { %p4249_p7 = pneg %p3013_p5  ;;  %s2553_s6 = scalar_lea.vmem %s307_s7, 8192 }
  0x23   : > { %p2554_p8 = scmp.ne.s32.totalorder %s307_s7, %s2553_s6 }
  0x25   : > { %s305_s22 = scalar_lea.hbm %s4276_s1, %s2339_s19  ;;  %p2556_p9 = pnand %p2554_p8, %p4249_p7 }
  0x26   : > { %s2866_s19 = smov [#allocation9]  }
  0x27   : > { %p2557_p10 = pneg %p2556_p9  ;;  %s2558_s20 = sshll.u32 %s2866_s19, 4  ;;  %s2559_s20 = int_to_ptr.vmem [resolvable:$false] %s2558_s20 }
  0x28   : > { %s2560_s21 = scalar_lea.vmem %s2559_s20, 16384  ;;  %p2561_p11 = scmp.lt.s32.totalorder %s307_s7, %s2559_s20 }
  0x29   : > { %p2562_p12 = scmp.lt.s32.totalorder %s2560_s21, %s2553_s6 }
  0x2b   : > { %p2563_p13 = por %p2562_p12, %p2561_p11 }
  0x2d   : > { %p2564_p1 = pnand %p2563_p13, %p2557_p10 }
  0x2f   : > { %2567 = shalt.err (!%p2564_p1)
}
  0x30   : > { %s2867_s23 = smov 512   ;;  %s4243_s6 = smov 256  }
  0x31   : > { %s4245_s16 = smov 16   ;;  %p355_p4 = scmp.lt.s32.totalorder %s2864_s14, 7 }
  0x32   : > { %2367 = dma.hbm_to_vmem [thread:$0]  (!%p3013_p5), %s305_s22, 8192, %s307_s7, %s3018_s5, %s2867_s23, %s4243_s6, %s4245_s16  }
  0x33   : > { %p3033_p8 = pnand %p2311_p6, %p355_p4  ;;  %s3038_s20 = sadd.s32 4294967295, %s2864_s14  }
  0x34   : > { %s42_s18 = sadd.s32 1, %s2856_s12  ;;  %s45_s1 = sadd.s32 1, %s2860_s13 }
  0x35   : > { %p43_p9 = scmp.ge.s32.totalorder %s42_s18, 2  ;;  %s52_s7 = sadd.s32 1, %s2844_s9 }
  0x36   : > { %p59_p10 = scmp.ne.s32.totalorder %s2844_s9, %s2840_s8  ;;  %p4254_p11 = scmp.ne.s32.totalorder %s2840_s8, %s2836_s30 }
  0x37   : > { %s4343_s18 = smov (%p43_p9, %s42_s18), 0  ;;  %s4345_s1 = smov (!%p43_p9, %s45_s1), %s2860_s13 }
  0x38   : > { %4279 = sst [smem:[#allocation31_spill]] %s4343_s18  ;;  %p3056_p6 = por %p60_p0, %p59_p10 }
  0x39   : > { %p66_p12 = scmp.eq.s32.totalorder %s3038_s20, 0  ;;  %p47_p13 = scmp.ge.s32.totalorder %s4345_s1, 3 }
  0x3a   : > { %s75_s23 = ssub.s32 %s2856_s12, %s4343_s18  ;;  %s4284_s16 = sadd.s32 1, %s2832_s29 }
  0x3b   : > { %p3066_p1 = por %p66_p12, %p4254_p11  ;;  %p76_p4 = scmp.eq.s32.totalorder %s75_s23, 0 }
  0x3c   : > { %s4347_s1 = smov (%p47_p13, %s4345_s1), 0  ;;  %p3082_p0 = por %p91_p2, %p66_p12 }
  0x3d   : > { %s4281_s6 = scalar_select %p3066_p1, 1, 0 }
  0x3e   : > { %4283 = sst [smem:[#allocation33_spill]] %s4347_s1  ;;  %s49_s11 = ssub.s32 %s2860_s13, %s4347_s1 }
  0x3f   : > { %4282 = sst [smem:[#allocation32_spill]] %s4281_s6  ;;  %p50_p9 = scmp.eq.s32.totalorder %s49_s11, 0 }
  0x40   : > { %s3075_s21 = scalar_select %p76_p4, %s2832_s29, %s4284_s16  }
  0x41   : > { %s4286_s18 = scalar_select %p3082_p0, 1, 0 }
  0x42   : > { %4285 = sst [smem:[#allocation34_spill]] %s3075_s21  ;;  %s176_s4 = sor.u32 %s75_s23, %s49_s11 }
  0x43   : > { %p177_p7 = scmp.eq.s32.totalorder %s176_s4, 0  ;;  %s179_s10 = sadd.s32 1, %s2820_s26 }
  0x44   : > { %s3088_s6 = scalar_select %p50_p9, %s2844_s9, %s52_s7  }
  0x45   : > { %s3091_s16 = scalar_select %p177_p7, %s2820_s26, %s179_s10  }
  0x46   : > { %4287 = sst [smem:[#allocation35_spill]] %s3088_s6  ;;  %p189_p13 = scmp.ne.s32.totalorder %s2820_s26, %s2816_s25 }
  0x47   : > { %4288 = sst [smem:[#allocation36_spill]] %s3091_s16  ;;  %p190_p4 = scmp.eq.s32.totalorder %s3038_s20, 5 }
  0x48   : > { %p195_p3 = scmp.ne.s32.totalorder %s2816_s25, %s2812_s24  ;;  %s4289_s27 = sadd.s32 4294967294, %s2864_s14  }
  0x49   : > { %p196_p2 = scmp.eq.s32.totalorder %s4289_s27, 5  ;;  %p3100_p12 = por %p190_p4, %p189_p13 }
  0x4a   : > { %p3107_p11 = por %p190_p4, %p59_p10  ;;  %p4294_p7 = scmp.ne.s32.totalorder %s2840_s8, %s2836_s30 }
  0x4b   : > { %p3111_p9 = por %p196_p2, %p195_p3  ;;  %s273_s7 = sand.u32 1, %s2844_s9  }
  0x4c   : > { %p3118_p0 = por %p196_p2, %p4294_p7  ;;  %s2338_s23 = sshll.u32 %s2860_s13, 12 }
  0x4d   : > { %s4292_s11 = scalar_select %p3111_p9, 1, 0 }
  0x4e   : > { %s4295_s10 = scalar_select %p3118_p0, 1, 0 }
  0x4f   : > { %4293 = sst [smem:[#allocation37_spill]] %s4292_s11  ;;  %s2297_s27 = sshll.u32 %s273_s7, 8 }
  0x50   : > { %4296 = sst [smem:[#allocation38_spill]] %s4295_s10  ;;  %s277_s16 = scalar_lea.vmem [#allocation6], %s2297_s27 }
  0x51   : > { %s4297_s0 = sld [smem:[#allocation39_spill]]  ;;  %s285_s26 = sshll.u32 %s277_s16, 4  ;;  %s286_s26 = int_to_ptr.vmem [resolvable:$true] %s285_s26 }
  0x52   : > { %p4298_p10 = scmp.lt.s32.totalorder %s2864_s14, 6  ;;  %s2304_s30 = sshll.u32 %s3002_s17, 1 }
  0x53   : > { %s274_s11 = scalar_lea.sflag [#allocation7], %s273_s7  ;;  %s2581_s13 = scalar_lea.vmem %s286_s26, 4096 }
  0x54   : > { %p3131_p3 = pnand %p4298_p10, %p3056_p6  ;;  %p2582_p4 = scmp.ne.s32.totalorder %s286_s26, %s2581_s13 }
  0x55   : > { %s2870_s6 = smov [#allocation6]  }
  0x56   : > { %p2570_p13 = pneg %p3131_p3  ;;  %s2586_s21 = sshll.u32 %s2870_s6, 4  ;;  %s2587_s21 = int_to_ptr.vmem [resolvable:$false] %s2586_s21 }
  0x57   : > { %s284_s29 = scalar_lea.hbm %s4297_s0, %s2338_s23  ;;  %s2588_s16 = scalar_lea.vmem %s2587_s21, 8192 }
  0x58   : > { %p2584_p2 = pnand %p2582_p4, %p2570_p13  ;;  %p2589_p0 = scmp.lt.s32.totalorder %s286_s26, %s2587_s21 }
  0x59   : > { %p2590_p9 = scmp.lt.s32.totalorder %s2588_s16, %s2581_s13 }
  0x5a   : > { %p2585_p7 = pneg %p2584_p2 }
  0x5b   : > { %p2591_p6 = por %p2590_p9, %p2589_p0 }
  0x5d   : > { %p2592_p10 = pnand %p2591_p6, %p2585_p7 }
  0x5f   : > { %2595 = shalt.err (!%p2592_p10)
}
  0x60   : > { %s4300_s22 = smov 16   ;;  %s4301_s23 = smov 256  }
  0x61   : > { %2364 = dma.hbm_to_vmem [thread:$0]  (!%p3131_p3), %s284_s29, 4096, %s286_s26, %s274_s11, %s4301_s23, %s4301_s23, %s4300_s22  }
  0x62   : > { %s2340_s7 = sshll.u32 %s2856_s12, 5  ;;  %s320_s27 = scalar_lea.vmem [#allocation11], %s2304_s30 }
  0x63   : > { %s328_s0 = sshll.u32 %s320_s27, 4  ;;  %s326_s10 = scalar_lea.hbm %s4233_s2, %s2340_s7  ;;  %s329_s0 = int_to_ptr.vmem [resolvable:$true] %s328_s0 }
  0x64   : > { %s2609_s13 = scalar_lea.vmem %s329_s0, 32  ;;  %p4302_p9 = pneg %p3013_p5 }
  0x65   : > { %p2610_p0 = scmp.ne.s32.totalorder %s329_s0, %s2609_s13  ;;  %s2871_s24 = smov [#allocation11]  }
  0x66   : > { %s2614_s21 = sshll.u32 %s2871_s24, 4  ;;  %s2615_s21 = int_to_ptr.vmem [resolvable:$false] %s2614_s21 }
  0x67   : > { %p2612_p13 = pnand %p2610_p0, %p4302_p9  ;;  %s2616_s16 = scalar_lea.vmem %s2615_s21, 64 }
  0x68   : > { %p2617_p2 = scmp.lt.s32.totalorder %s329_s0, %s2615_s21  ;;  %p2618_p3 = scmp.lt.s32.totalorder %s2616_s16, %s2609_s13 }
  0x69   : > { %p2613_p4 = pneg %p2612_p13 }
  0x6a   : > { %p2619_p7 = por %p2618_p3, %p2617_p2 }
  0x6c   : > { %p2620_p6 = pnand %p2619_p7, %p2613_p4 }
  0x6e   : > { %2623 = shalt.err (!%p2620_p6)
}
  0x6f   : > { %2370 = dma.hbm_to_vmem [thread:$0]  (!%p3013_p5), %s326_s10, 32, %s329_s0, %s3018_s5  }
  0x70   : > { %s2342_s26 = sshll.u32 %s2856_s12, 13  ;;  %s4303_s29 = sshll.u32 %s3002_s17, 9 }
  0x71   : > { %s339_s9 = scalar_lea.vmem [#allocation12], %s4303_s29  ;;  %s346_s27 = scalar_lea.hbm %s4234_s3, %s2342_s26 }
  0x72   : > { %s347_s11 = sshll.u32 %s339_s9, 4  ;;  %s336_s6 = scalar_lea.sflag [#allocation13], %s3002_s17  ;;  %s348_s11 = int_to_ptr.vmem [resolvable:$true] %s347_s11 }
  0x73   : > { %s2637_s13 = scalar_lea.vmem %s348_s11, 8192  ;;  %p4304_p0 = pmov %p4302_p9 }
  0x74   : > { %p2638_p10 = scmp.ne.s32.totalorder %s348_s11, %s2637_s13  ;;  %s2872_s24 = smov [#allocation12]  }
  0x75   : > { %s2642_s21 = sshll.u32 %s2872_s24, 4  ;;  %s2643_s21 = int_to_ptr.vmem [resolvable:$false] %s2642_s21 }
  0x76   : > { %p2640_p9 = pnand %p2638_p10, %p4304_p0  ;;  %s2644_s0 = scalar_lea.vmem %s2643_s21, 16384 }
  0x77   : > { %p2645_p4 = scmp.lt.s32.totalorder %s348_s11, %s2643_s21  ;;  %p2646_p2 = scmp.lt.s32.totalorder %s2644_s0, %s2637_s13 }
  0x78   : > { %p2641_p13 = pneg %p2640_p9 }
  0x79   : > { %p2647_p3 = por %p2646_p2, %p2645_p4 }
  0x7b   : > { %p2648_p7 = pnand %p2647_p3, %p2641_p13 }
  0x7d   : > { %2651 = shalt.err (!%p2648_p7)
}
  0x7e   : > { %2373 = dma.hbm_to_vmem [thread:$0]  (!%p3013_p5), %s346_s27, 8192, %s348_s11, %s336_s6, %s4301_s23, %s4301_s23, %s4300_s22  }
  0x7f   : > { %359 = sbr.rel (%p3033_p8) target bundleno = 1292 (0x50c), region = 40  ;;  %s361_s17 = sand.u32 (!%p3033_p8), 1, %s2840_s8  }
  0x80   : > { %s2312_s10 = sshll.u32 (!%p3033_p8), %s361_s17, 8  ;;  %s362_s16 = scalar_lea.sflag (!%p3033_p8), [#allocation7], %s361_s17 }
  0x81   : > { %s3171_s26 = scalar_lea.vmem (!%p3033_p8), [#allocation6], %s2312_s10 }
  0x84   : > { %2787 = dma.done.wait (%p3066_p1), %s362_s16, 4096  }
  0x85   : > { %2789 = vsyncadd (%p3066_p1), %s362_s16, 4294963200  ;;  %s370_s15 = sand.u32 1, %s3038_s20   ;;  %s372_s22 = sand.u32 1, %s2828_s28  }
  0x86   : > { %s2313_s19 = sshll.u32 %s372_s22, 9  ;;  %s371_s23 = scalar_lea.sflag [#allocation10], %s370_s15 }
  0x87   : > { %s3181_s29 = scalar_lea.vmem [#allocation9], %s2313_s19  ;;  %p4306_p5 = scmp.ne.s32.totalorder %s4286_s18, 0 }
  0x89   : > { %2791 = dma.done.wait (%p4306_p5), %s371_s23, 8224  }
  0x8a   : > { %2793 = vsyncadd (%p4306_p5), %s371_s23, 4294959072  ;;  %s2314_s9 = sshll.u32 %s372_s22, 1  ;;  %s389_s30 = scalar_lea.sflag [#allocation13], %s372_s22 }
  0x8b   : > { %s3187_s11 = scalar_lea.vmem [#allocation11], %s2314_s9  ;;  %s3189_s7 = scalar_lea.vmem [#allocation12], %s2313_s19 }
  0x8c   : > { %2795 = dma.done.wait (%p4306_p5), %s389_s30, 8192  }
  0x8d   : > { %2797 = vsyncadd (%p4306_p5), %s389_s30, 4294959104  ;;  %s431_s27 = sand.u32 1, %s2816_s25   ;;  %s3202_s21 = scalar_lea.vmem [#allocation17], %s2312_s10 }
  0x8e   : > { %s2316_s6 = sshll.u32 %s431_s27, 8  ;;  %s4307_s0 = sld [smem:[#allocation28_spill]] }
  0x8f   : > { %s3198_s13 = scalar_lea.vmem [#allocation14], %s2316_s6  ;;  %s3200_s24 = scalar_lea.vmem [#allocation15], %s2316_s6 }
  0x94   : > { %p2319_p8 = scmp.ne.s32.totalorder %s4307_s0, 0 }
  0x96   : > { %460 = sbr.rel (%p2319_p8) target bundleno = 503 (0x1f7), region = 60 }
  0x9b   : > { %v3206_v0 = vld [vmem:[%s3171_s26] sm:$0xff]  ;;  %v3209_v1 = vld [vmem:[%s3171_s26 + $0x8] sm:$0xff]  ;;  %v3220_v5 = vld [vmem:[%s3171_s26 + $0x10] sm:$0xff]  ;;  %vm686_vm0 = vcmask 7168  }
  0x9c   : > { %v3212_v2 = vld [vmem:[%s3171_s26 + $0x20] sm:$0xff]  ;;  %v493_v3 = vadd.f32 %v3209_v1, %v3206_v0  ;;  %v3217_v4 = vld [vmem:[%s3171_s26 + $0x28] sm:$0xff]  ;;  %v3223_v6 = vld [vmem:[%s3171_s26 + $0x18] sm:$0xff] }
  0x9d   : > { %v499_v7 = vadd.f32 %v3217_v4, %v3212_v2  ;;  %v3228_v8 = vld [vmem:[%s3171_s26 + $0x30] sm:$0xff]  ;;  %v3231_v9 = vld [vmem:[%s3171_s26 + $0x38] sm:$0xff]  ;;  %v496_v10 = vadd.f32 %v3223_v6, %v3220_v5  ;;  %v3238_v12 = vld [vmem:[%s3171_s26 + $0x40] sm:$0xff] }
  0x9e   : > { %494 = vadd.xlane.f32.xlu0 %v493_v3  ;;  %v502_v11 = vadd.f32 %v3231_v9, %v3228_v8  ;;  %v3241_v13 = vld [vmem:[%s3171_s26 + $0x48] sm:$0xff]  ;;  %v3244_v14 = vld [vmem:[%s3171_s26 + $0x50] sm:$0xff]  ;;  %v3247_v15 = vld [vmem:[%s3171_s26 + $0x58] sm:$0xff] }
  0x9f   : > { %500 = vadd.xlane.f32.xlu1 %v499_v7  ;;  %v505_v16 = vadd.f32 %v3241_v13, %v3238_v12  ;;  %v508_v17 = vadd.f32 %v3247_v15, %v3244_v14  ;;  %v3254_v18 = vld [vmem:[%s3171_s26 + $0x60] sm:$0xff]  ;;  %v3257_v19 = vld [vmem:[%s3171_s26 + $0x68] sm:$0xff]  ;;  %v3260_v20 = vld [vmem:[%s3171_s26 + $0x70] sm:$0xff] }
  0xa0   : > { %v3263_v21 = vld [vmem:[%s3171_s26 + $0x78] sm:$0xff]  ;;  %v511_v22 = vadd.f32 %v3257_v19, %v3254_v18  ;;  %v3270_v24 = vld [vmem:[%s3171_s26 + $0x80] sm:$0xff]  ;;  %v3273_v25 = vld [vmem:[%s3171_s26 + $0x88] sm:$0xff] }
  0xa1   : > { %v514_v23 = vadd.f32 %v3263_v21, %v3260_v20  ;;  %v3276_v26 = vld [vmem:[%s3171_s26 + $0x90] sm:$0xff]  ;;  %v3279_v27 = vld [vmem:[%s3171_s26 + $0x98] sm:$0xff]  ;;  %v517_v28 = vadd.f32 %v3273_v25, %v3270_v24  ;;  %v3286_v30 = vld [vmem:[%s3171_s26 + $0xa0] sm:$0xff] }
  0xa2   : > { %497 = vadd.xlane.f32.xlu0 %v496_v10  ;;  %v520_v29 = vadd.f32 %v3279_v27, %v3276_v26  ;;  %v3289_v31 = vld [vmem:[%s3171_s26 + $0xa8] sm:$0xff]  ;;  %v3292_v32 = vld [vmem:[%s3171_s26 + $0xb0] sm:$0xff]  ;;  %v3295_v33 = vld [vmem:[%s3171_s26 + $0xb8] sm:$0xff] }
  0xa3   : > { %503 = vadd.xlane.f32.xlu1 %v502_v11  ;;  %v523_v34 = vadd.f32 %v3289_v31, %v3286_v30  ;;  %v526_v35 = vadd.f32 %v3295_v33, %v3292_v32  ;;  %v3302_v36 = vld [vmem:[%s3171_s26 + $0xc0] sm:$0xff]  ;;  %v3305_v37 = vld [vmem:[%s3171_s26 + $0xc8] sm:$0xff]  ;;  %v3308_v38 = vld [vmem:[%s3171_s26 + $0xd0] sm:$0xff] }
  0xa4   : > { %v3311_v39 = vld [vmem:[%s3171_s26 + $0xd8] sm:$0xff]  ;;  %v529_v40 = vadd.f32 %v3305_v37, %v3302_v36  ;;  %v3318_v42 = vld [vmem:[%s3171_s26 + $0xe0] sm:$0xff]  ;;  %v3321_v43 = vld [vmem:[%s3171_s26 + $0xe8] sm:$0xff] }
  0xa5   : > { %v532_v41 = vadd.f32 %v3311_v39, %v3308_v38  ;;  %v3324_v44 = vld [vmem:[%s3171_s26 + $0xf0] sm:$0xff]  ;;  %v3327_v45 = vld [vmem:[%s3171_s26 + $0xf8] sm:$0xff]  ;;  %v535_v46 = vadd.f32 %v3321_v43, %v3318_v42 }
  0xa6   : > { %506 = vadd.xlane.f32.xlu0 %v505_v16  ;;  %v538_v47 = vadd.f32 %v3327_v45, %v3324_v44 }
  0xa7   : > { %509 = vadd.xlane.f32.xlu1 %v508_v17 }
  0xaa   : > { %512 = vadd.xlane.f32.xlu0 %v511_v22 }
  0xab   : > { %515 = vadd.xlane.f32.xlu1 %v514_v23 }
  0xae   : > { %518 = vadd.xlane.f32.xlu0 %v517_v28 }
  0xaf   : > { %521 = vadd.xlane.f32.xlu1 %v520_v29 }
  0xb2   : > { %524 = vadd.xlane.f32.xlu0 %v523_v34 }
  0xb3   : > { %527 = vadd.xlane.f32.xlu1 %v526_v35 }
  0xb6   : > { %530 = vadd.xlane.f32.xlu0 %v529_v40 }
  0xb7   : > { %533 = vadd.xlane.f32.xlu1 %v532_v41 }
  0xba   : > { %536 = vadd.xlane.f32.xlu0 %v535_v46 }
  0xbb   : > { %539 = vadd.xlane.f32.xlu1 %v538_v47 }
 0x127   : > { %v495_v48 = vpop.xlane.xlu0 %494 }
 0x128   : > { %v542_v49 = vmul.f32 0.00390625, %v495_v48  ;;  %v501_v50 = vpop.xlane.xlu1 %500 }
 0x129   : > { %v544_v51 = vmul.f32 0.00390625, %v501_v50 }
 0x12a   : > { %v3334_v52 = vsub.f32 %v3206_v0, %v542_v49  ;;  %v3337_v53 = vsub.f32 %v3209_v1, %v542_v49  ;;  %687 = vst.msk [vmem:[#allocation3] sm:$0xff] %vm686_vm0, %v542_v49 }
 0x12b   : > { %v3341_v54 = vsub.f32 %v3212_v2, %v544_v51  ;;  %v3344_v55 = vsub.f32 %v3217_v4, %v544_v51  ;;  %689 = vst.msk [vmem:[#allocation3 + $0x10] sm:$0xff] %vm686_vm0, %v544_v51  ;;  %v498_v56 = vpop.xlane.xlu0 %497 }
 0x12c   : > { %v543_v57 = vmul.f32 0.00390625, %v498_v56  ;;  %v504_v58 = vpop.xlane.xlu1 %503  ;;  %v590_v59 = vmul.f32 %v3334_v52, %v3334_v52  ;;  %v591_v60 = vmul.f32 %v3337_v53, %v3337_v53 }
 0x12d   : > { %v545_v61 = vmul.f32 0.00390625, %v504_v58  ;;  %v594_v62 = vmul.f32 %v3341_v54, %v3341_v54  ;;  %v595_v63 = vmul.f32 %v3344_v55, %v3344_v55 }
 0x12e   : > { %v3356_v0 = vsub.f32 %v3220_v5, %v543_v57  ;;  %v3359_v1 = vsub.f32 %v3223_v6, %v543_v57  ;;  %688 = vst.msk [vmem:[#allocation3 + $0x8] sm:$0xff] %vm686_vm0, %v543_v57  ;;  %v622_v2 = vadd.f32 %v591_v60, %v590_v59 }
 0x12f   : > { %v3363_v3 = vsub.f32 %v3228_v8, %v545_v61  ;;  %v3366_v4 = vsub.f32 %v3231_v9, %v545_v61  ;;  %690 = vst.msk [vmem:[#allocation3 + $0x18] sm:$0xff] %vm686_vm0, %v545_v61  ;;  %v507_v7 = vpop.xlane.xlu0 %506  ;;  %v628_v5 = vadd.f32 %v595_v63, %v594_v62 }
 0x130   : > { %v546_v10 = vmul.f32 0.00390625, %v507_v7  ;;  %623 = vadd.xlane.f32.xlu0 %v622_v2  ;;  %v510_v11 = vpop.xlane.xlu1 %509  ;;  %v592_v6 = vmul.f32 %v3356_v0, %v3356_v0  ;;  %v593_v16 = vmul.f32 %v3359_v1, %v3359_v1 }
 0x131   : > { %v547_v17 = vmul.f32 0.00390625, %v510_v11  ;;  %v596_v8 = vmul.f32 %v3363_v3, %v3363_v3  ;;  %v597_v9 = vmul.f32 %v3366_v4, %v3366_v4 }
 0x132   : > { %v3378_v22 = vsub.f32 %v3238_v12, %v546_v10  ;;  %v3381_v23 = vsub.f32 %v3241_v13, %v546_v10  ;;  %691 = vst.msk [vmem:[#allocation3 + $0x20] sm:$0xff] %vm686_vm0, %v546_v10  ;;  %v625_v28 = vadd.f32 %v593_v16, %v592_v6 }
 0x133   : > { %v3385_v29 = vsub.f32 %v3244_v14, %v547_v17  ;;  %v3388_v34 = vsub.f32 %v3247_v15, %v547_v17  ;;  %692 = vst.msk [vmem:[#allocation3 + $0x28] sm:$0xff] %vm686_vm0, %v547_v17  ;;  %v513_v35 = vpop.xlane.xlu0 %512  ;;  %v631_v41 = vadd.f32 %v597_v9, %v596_v8 }
 0x134   : > { %v548_v40 = vmul.f32 0.00390625, %v513_v35  ;;  %629 = vadd.xlane.f32.xlu0 %v628_v5  ;;  %626 = vadd.xlane.f32.xlu1 %v625_v28  ;;  %v516_v12 = vpop.xlane.xlu1 %515  ;;  %v598_v13 = vmul.f32 %v3378_v22, %v3378_v22  ;;  %v599_v46 = vmul.f32 %v3381_v23, %v3381_v23 }
 0x135   : > { %v549_v47 = vmul.f32 0.00390625, %v516_v12  ;;  %v600_v14 = vmul.f32 %v3385_v29, %v3385_v29  ;;  %v601_v15 = vmul.f32 %v3388_v34, %v3388_v34 }
 0x136   : > { %v3400_v48 = vsub.f32 %v3254_v18, %v548_v40  ;;  %v3403_v49 = vsub.f32 %v3257_v19, %v548_v40  ;;  %693 = vst.msk [vmem:[#allocation3 + $0x30] sm:$0xff] %vm686_vm0, %v548_v40  ;;  %v634_v50 = vadd.f32 %v599_v46, %v598_v13 }
 0x137   : > { %v3407_v51 = vsub.f32 %v3260_v20, %v549_v47  ;;  %v3410_v56 = vsub.f32 %v3263_v21, %v549_v47  ;;  %694 = vst.msk [vmem:[#allocation3 + $0x38] sm:$0xff] %vm686_vm0, %v549_v47  ;;  %v519_v57 = vpop.xlane.xlu0 %518  ;;  %v637_v59 = vadd.f32 %v601_v15, %v600_v14 }
 0x138   : > { %v550_v58 = vmul.f32 0.00390625, %v519_v57  ;;  %632 = vadd.xlane.f32.xlu1 %v631_v41  ;;  %635 = vadd.xlane.f32.xlu0 %v634_v50  ;;  %v522_v18 = vpop.xlane.xlu1 %521  ;;  %v602_v19 = vmul.f32 %v3400_v48, %v3400_v48  ;;  %v603_v60 = vmul.f32 %v3403_v49, %v3403_v49 }
 0x139   : > { %v551_v61 = vmul.f32 0.00390625, %v522_v18  ;;  %v604_v20 = vmul.f32 %v3407_v51, %v3407_v51  ;;  %v605_v21 = vmul.f32 %v3410_v56, %v3410_v56 }
 0x13a   : > { %v3422_v62 = vsub.f32 %v3270_v24, %v550_v58  ;;  %v3425_v63 = vsub.f32 %v3273_v25, %v550_v58  ;;  %695 = vst.msk [vmem:[#allocation3 + $0x40] sm:$0xff] %vm686_vm0, %v550_v58  ;;  %v640_v2 = vadd.f32 %v603_v60, %v602_v19 }
 0x13b   : > { %v3429_v7 = vsub.f32 %v3276_v26, %v551_v61  ;;  %v3432_v10 = vsub.f32 %v3279_v27, %v551_v61  ;;  %696 = vst.msk [vmem:[#allocation3 + $0x48] sm:$0xff] %vm686_vm0, %v551_v61  ;;  %v525_v11 = vpop.xlane.xlu0 %524  ;;  %v643_v6 = vadd.f32 %v605_v21, %v604_v20 }
 0x13c   : > { %v552_v5 = vmul.f32 0.00390625, %v525_v11  ;;  %638 = vadd.xlane.f32.xlu1 %v637_v59  ;;  %641 = vadd.xlane.f32.xlu0 %v640_v2  ;;  %v528_v24 = vpop.xlane.xlu1 %527  ;;  %v606_v25 = vmul.f32 %v3422_v62, %v3422_v62  ;;  %v607_v16 = vmul.f32 %v3425_v63, %v3425_v63 }
 0x13d   : > { %v553_v17 = vmul.f32 0.00390625, %v528_v24  ;;  %v608_v26 = vmul.f32 %v3429_v7, %v3429_v7  ;;  %v609_v27 = vmul.f32 %v3432_v10, %v3432_v10 }
 0x13e   : > { %v3444_v8 = vsub.f32 %v3286_v30, %v552_v5  ;;  %v3447_v9 = vsub.f32 %v3289_v31, %v552_v5  ;;  %697 = vst.msk [vmem:[#allocation3 + $0x50] sm:$0xff] %vm686_vm0, %v552_v5  ;;  %v646_v28 = vadd.f32 %v607_v16, %v606_v25  ;;  %v2873_v16 = vmov 0.0  }
 0x13f   : > { %v3451_v35 = vsub.f32 %v3292_v32, %v553_v17  ;;  %v3454_v40 = vsub.f32 %v3295_v33, %v553_v17  ;;  %698 = vst.msk [vmem:[#allocation3 + $0x58] sm:$0xff] %vm686_vm0, %v553_v17  ;;  %v531_v12 = vpop.xlane.xlu0 %530  ;;  %v649_v13 = vadd.f32 %v609_v27, %v608_v26  ;;  %927 = vst [vmem:[#allocation5 + $0x80] sm:$0xff] %v2873_v16 }
 0x140   : > { %v554_v41 = vmul.f32 0.00390625, %v531_v12  ;;  %644 = vadd.xlane.f32.xlu1 %v643_v6  ;;  %647 = vadd.xlane.f32.xlu0 %v646_v28  ;;  %v534_v30 = vpop.xlane.xlu1 %533  ;;  %v610_v31 = vmul.f32 %v3444_v8, %v3444_v8  ;;  %v611_v46 = vmul.f32 %v3447_v9, %v3447_v9  ;;  %928 = vst [vmem:[#allocation5 + $0xc8] sm:$0xff] %v2873_v16  ;;  %929 = vst [vmem:[#allocation5 + $0xe8] sm:$0xff] %v2873_v16 }
 0x141   : > { %v555_v47 = vmul.f32 0.00390625, %v534_v30  ;;  %v612_v32 = vmul.f32 %v3451_v35, %v3451_v35  ;;  %v613_v33 = vmul.f32 %v3454_v40, %v3454_v40  ;;  %930 = vst [vmem:[#allocation5 + $0x78] sm:$0xff] %v2873_v16  ;;  %931 = vst [vmem:[#allocation5 + $0x8] sm:$0xff] %v2873_v16 }
 0x142   : > { %v3466_v14 = vsub.f32 %v3302_v36, %v554_v41  ;;  %v3469_v15 = vsub.f32 %v3305_v37, %v554_v41  ;;  %699 = vst.msk [vmem:[#allocation3 + $0x60] sm:$0xff] %vm686_vm0, %v554_v41  ;;  %v652_v50 = vadd.f32 %v611_v46, %v610_v31  ;;  %932 = vst [vmem:[#allocation5 + $0x90] sm:$0xff] %v2873_v16 }
 0x143   : > { %v3473_v57 = vsub.f32 %v3308_v38, %v555_v47  ;;  %v3476_v58 = vsub.f32 %v3311_v39, %v555_v47  ;;  %700 = vst.msk [vmem:[#allocation3 + $0x68] sm:$0xff] %vm686_vm0, %v555_v47  ;;  %v537_v18 = vpop.xlane.xlu0 %536  ;;  %v655_v19 = vadd.f32 %v613_v33, %v612_v32  ;;  %933 = vst [vmem:[#allocation5 + $0x58] sm:$0xff] %v2873_v16 }
 0x144   : > { %v556_v59 = vmul.f32 0.00390625, %v537_v18  ;;  %650 = vadd.xlane.f32.xlu1 %v649_v13  ;;  %653 = vadd.xlane.f32.xlu0 %v652_v50  ;;  %v540_v36 = vpop.xlane.xlu1 %539  ;;  %v614_v37 = vmul.f32 %v3466_v14, %v3466_v14  ;;  %v615_v60 = vmul.f32 %v3469_v15, %v3469_v15  ;;  %934 = vst [vmem:[#allocation5 + $0xa8] sm:$0xff] %v2873_v16  ;;  %935 = vst [vmem:[#allocation5 + $0xd0] sm:$0xff] %v2873_v16 }
 0x145   : > { %v557_v61 = vmul.f32 0.00390625, %v540_v36  ;;  %v616_v38 = vmul.f32 %v3473_v57, %v3473_v57  ;;  %v617_v39 = vmul.f32 %v3476_v58, %v3476_v58  ;;  %936 = vst [vmem:[#allocation5 + $0xb0] sm:$0xff] %v2873_v16  ;;  %937 = vst [vmem:[#allocation5 + $0x38] sm:$0xff] %v2873_v16 }
 0x146   : > { %v3488_v20 = vsub.f32 %v3318_v42, %v556_v59  ;;  %v3491_v21 = vsub.f32 %v3321_v43, %v556_v59  ;;  %701 = vst.msk [vmem:[#allocation3 + $0x70] sm:$0xff] %vm686_vm0, %v556_v59  ;;  %v658_v2 = vadd.f32 %v615_v60, %v614_v37  ;;  %938 = vst [vmem:[#allocation5 + $0x40] sm:$0xff] %v2873_v16 }
 0x147   : > { %v3495_v11 = vsub.f32 %v3324_v44, %v557_v61  ;;  %v3498_v5 = vsub.f32 %v3327_v45, %v557_v61  ;;  %702 = vst.msk [vmem:[#allocation3 + $0x78] sm:$0xff] %vm686_vm0, %v557_v61  ;;  %v661_v24 = vadd.f32 %v617_v39, %v616_v38  ;;  %939 = vst [vmem:[#allocation5 + $0xe0] sm:$0xff] %v2873_v16 }
 0x148   : > { %656 = vadd.xlane.f32.xlu1 %v655_v19  ;;  %659 = vadd.xlane.f32.xlu0 %v658_v2  ;;  %v618_v42 = vmul.f32 %v3488_v20, %v3488_v20  ;;  %v619_v43 = vmul.f32 %v3491_v21, %v3491_v21  ;;  %940 = vst [vmem:[#allocation5 + $0x60] sm:$0xff] %v2873_v16  ;;  %941 = vst [vmem:[#allocation5 + $0x18] sm:$0xff] %v2873_v16 }
 0x149   : > { %v620_v6 = vmul.f32 %v3495_v11, %v3495_v11  ;;  %v621_v44 = vmul.f32 %v3498_v5, %v3498_v5  ;;  %942 = vst [vmem:[#allocation5 + $0x68] sm:$0xff] %v2873_v16  ;;  %943 = vst [vmem:[#allocation5 + $0x10] sm:$0xff] %v2873_v16 }
 0x14a   : > { %v664_v25 = vadd.f32 %v619_v43, %v618_v42  ;;  %944 = vst [vmem:[#allocation5 + $0x70] sm:$0xff] %v2873_v16  ;;  %945 = vst [vmem:[#allocation5 + $0x50] sm:$0xff] %v2873_v16 }
 0x14b   : > { %v667_v45 = vadd.f32 %v621_v44, %v620_v6  ;;  %946 = vst [vmem:[#allocation5 + $0xa0] sm:$0xff] %v2873_v16  ;;  %947 = vst [vmem:[#allocation5 + $0xd8] sm:$0xff] %v2873_v16 }
 0x14c   : > { %662 = vadd.xlane.f32.xlu1 %v661_v24  ;;  %665 = vadd.xlane.f32.xlu0 %v664_v25  ;;  %948 = vst [vmem:[#allocation5 + $0x30] sm:$0xff] %v2873_v16  ;;  %949 = vst [vmem:[#allocation5 + $0x20] sm:$0xff] %v2873_v16 }
 0x14d   : > { %950 = vst [vmem:[#allocation5 + $0xf0] sm:$0xff] %v2873_v16  ;;  %951 = vst [vmem:[#allocation5 + $0x88] sm:$0xff] %v2873_v16 }
 0x14e   : > { %952 = vst [vmem:[#allocation5 + $0x48] sm:$0xff] %v2873_v16  ;;  %953 = vst [vmem:[#allocation5 + $0xf8] sm:$0xff] %v2873_v16 }
 0x14f   : > { %954 = vst [vmem:[#allocation5 + $0xc0] sm:$0xff] %v2873_v16  ;;  %955 = vst [vmem:[#allocation5 + $0xb8] sm:$0xff] %v2873_v16 }
 0x150   : > { %668 = vadd.xlane.f32.xlu1 %v667_v45  ;;  %956 = vst [vmem:[#allocation5] sm:$0xff] %v2873_v16  ;;  %957 = vst [vmem:[#allocation5 + $0x28] sm:$0xff] %v2873_v16 }
 0x151   : > { %958 = vst [vmem:[#allocation5 + $0x98] sm:$0xff] %v2873_v16 }
 0x1b9   : > { %v624_v17 = vpop.xlane.xlu0 %623 }
 0x1ba   : > { %v670_v26 = vmul.f32 0.00390625, %v624_v17 }
 0x1bc   : > { %v703_v27 = vadd.f32 1e-09, %v670_v26 }
 0x1bd   : > { %v627_v28 = vpop.xlane.xlu1 %626  ;;  %v630_v12 = vpop.xlane.xlu0 %629 }
 0x1be   : > { %2506 = vrsqrt.f32 %v703_v27  ;;  %v671_v41 = vmul.f32 0.00390625, %v627_v28  ;;  %v672_v30 = vmul.f32 0.00390625, %v630_v12  ;;  %vm721_vm1 = vcmp.eq.f32.partialorder %v703_v27, inf }
 0x1bf   : > { %vm723_vm2 = vcmp.eq.f32.partialorder %v703_v27, 0.0  ;;  %v724_v2 = vand.u32 2147483648, %v703_v27 }
 0x1c0   : > { %v3509_v13 = vadd.f32 1e-09, %v671_v41  ;;  %v3511_v31 = vadd.f32 1e-09, %v672_v30 }
 0x1c1   : > { %v633_v46 = vpop.xlane.xlu1 %632  ;;  %v636_v47 = vpop.xlane.xlu0 %635 }
 0x1c2   : > { %v673_v32 = vmul.f32 0.00390625, %v633_v46  ;;  %v674_v33 = vmul.f32 0.00390625, %v636_v47  ;;  %2508 = vrsqrt.f32 %v3509_v13  ;;  %vm728_vm3 = vcmp.eq.f32.partialorder %v3509_v13, inf }
 0x1c3   : > { %2510 = vrsqrt.f32 %v3511_v31  ;;  %vm730_vm4 = vcmp.eq.f32.partialorder %v3509_v13, 0.0  ;;  %v731_v6 = vand.u32 2147483648, %v3509_v13  ;;  %vm735_vm5 = vcmp.eq.f32.partialorder %v3511_v31, inf }
 0x1c4   : > { %v3515_v50 = vadd.f32 1e-09, %v673_v32  ;;  %v3517_v18 = vadd.f32 1e-09, %v674_v33  ;;  %vm737_vm6 = vcmp.eq.f32.partialorder %v3511_v31, 0.0  ;;  %v738_v16 = vand.u32 2147483648, %v3511_v31 }
 0x1c5   : > { %v639_v59 = vpop.xlane.xlu1 %638  ;;  %v642_v36 = vpop.xlane.xlu0 %641 }
 0x1c6   : > { %v675_v19 = vmul.f32 0.00390625, %v639_v59  ;;  %v676_v37 = vmul.f32 0.00390625, %v642_v36  ;;  %2512 = vrsqrt.f32 %v3515_v50  ;;  %vm742_vm7 = vcmp.eq.f32.partialorder %v3515_v50, inf }
 0x1c7   : > { %2514 = vrsqrt.f32 %v3517_v18  ;;  %vm744_vm8 = vcmp.eq.f32.partialorder %v3515_v50, 0.0  ;;  %v745_v47 = vand.u32 2147483648, %v3515_v50  ;;  %vm749_vm9 = vcmp.eq.f32.partialorder %v3517_v18, inf }
 0x1c8   : > { %v3521_v60 = vadd.f32 1e-09, %v675_v19  ;;  %v3523_v61 = vadd.f32 1e-09, %v676_v37  ;;  %vm751_vm10 = vcmp.eq.f32.partialorder %v3517_v18, 0.0  ;;  %v752_v36 = vand.u32 2147483648, %v3517_v18 }
 0x1c9   : > { %v645_v38 = vpop.xlane.xlu1 %644  ;;  %v648_v39 = vpop.xlane.xlu0 %647 }
 0x1ca   : > { %v677_v24 = vmul.f32 0.00390625, %v645_v38  ;;  %v678_v42 = vmul.f32 0.00390625, %v648_v39  ;;  %2516 = vrsqrt.f32 %v3521_v60  ;;  %vm756_vm11 = vcmp.eq.f32.partialorder %v3521_v60, inf }
 0x1cb   : > { %v2507_v43 = vpop.eup %2506  ;;  %2518 = vrsqrt.f32 %v3523_v61  ;;  %vm758_vm12 = vcmp.eq.f32.partialorder %v3521_v60, 0.0  ;;  %vm763_vm13 = vcmp.eq.f32.partialorder %v3523_v61, inf  ;;  %vm765_vm14 = vcmp.eq.f32.partialorder %v3523_v61, 0.0 }
 0x1cc   : > { %v720_v44 = vmul.f32 %v2507_v43, %v703_v27  ;;  %v863_v25 = vmul.f32 %v2507_v43, %v3334_v52  ;;  %v864_v45 = vmul.f32 %v2507_v43, %v3337_v53  ;;  %v3535_v17 = vadd.f32 1e-09, %v677_v24 }
 0x1cd   : > { %v651_v26 = vpop.xlane.xlu1 %650  ;;  %v654_v28 = vpop.xlane.xlu0 %653  ;;  %v3539_v52 = vadd.f32 1e-09, %v678_v42 }
 0x1ce   : > { %v722_v12 = vsel %vm721_vm1, %v703_v27, %v720_v44  ;;  %895 = vst [vmem:[#allocation2 + $0xb0] sm:$0xff] %v863_v25  ;;  %896 = vst [vmem:[#allocation2] sm:$0xff] %v864_v45  ;;  %v679_v53 = vmul.f32 0.00390625, %v651_v26  ;;  %2520 = vrsqrt.f32 %v3535_v17  ;;  %v680_v30 = vmul.f32 0.00390625, %v654_v28 }
 0x1cf   : > { %v725_v41 = vsel %vm723_vm2, %v724_v2, %v722_v12  ;;  %v2509_v46 = vpop.eup %2508  ;;  %2522 = vrsqrt.f32 %v3539_v52  ;;  %vm770_vm15 = vcmp.eq.f32.partialorder %v3535_v17, inf  ;;  %vm772_vm1 = vcmp.eq.f32.partialorder %v3535_v17, 0.0 }
 0x1d0   : > { %831 = vst.msk [vmem:[#allocation4] sm:$0xff] %vm686_vm0, %v725_v41  ;;  %v2511_v32 = vpop.eup %2510  ;;  %v727_v27 = vmul.f32 %v2509_v46, %v3509_v13  ;;  %v865_v33 = vmul.f32 %v2509_v46, %v3356_v0  ;;  %v866_v59 = vmul.f32 %v2509_v46, %v3359_v1  ;;  %v3557_v39 = vadd.f32 1e-09, %v679_v53 }
 0x1d1   : > { %v734_v19 = vmul.f32 %v2511_v32, %v3511_v31  ;;  %v867_v37 = vmul.f32 %v2511_v32, %v3341_v54  ;;  %v868_v38 = vmul.f32 %v2511_v32, %v3344_v55  ;;  %v657_v2 = vpop.xlane.xlu1 %656  ;;  %v759_v0 = vand.u32 2147483648, %v3521_v60  ;;  %v660_v54 = vpop.xlane.xlu0 %659 }
 0x1d2   : > { %v729_v24 = vsel %vm728_vm3, %v3509_v13, %v727_v27  ;;  %897 = vst [vmem:[#allocation2 + $0xd8] sm:$0xff] %v865_v33  ;;  %898 = vst [vmem:[#allocation2 + $0x18] sm:$0xff] %v866_v59  ;;  %v3564_v1 = vadd.f32 1e-09, %v680_v30  ;;  %2524 = vrsqrt.f32 %v3557_v39  ;;  %v681_v53 = vmul.f32 0.00390625, %v657_v2 }
 0x1d3   : > { %v2513_v42 = vpop.eup %2512  ;;  %v732_v55 = vsel %vm730_vm4, %v731_v6, %v729_v24  ;;  %v736_v43 = vsel %vm735_vm5, %v3511_v31, %v734_v19  ;;  %899 = vst [vmem:[#allocation2 + $0x50] sm:$0xff] %v867_v37  ;;  %900 = vst [vmem:[#allocation2 + $0x68] sm:$0xff] %v868_v38  ;;  %vm777_vm2 = vcmp.eq.f32.partialorder %v3539_v52, inf  ;;  %vm779_vm3 = vcmp.eq.f32.partialorder %v3539_v52, 0.0 }
 0x1d4   : > { %v2515_v44 = vpop.eup %2514  ;;  %832 = vst.msk [vmem:[#allocation4 + $0x8] sm:$0xff] %vm686_vm0, %v732_v55  ;;  %v739_v25 = vsel %vm737_vm6, %v738_v16, %v736_v43  ;;  %v741_v45 = vmul.f32 %v2513_v42, %v3515_v50  ;;  %v869_v13 = vmul.f32 %v2513_v42, %v3363_v3  ;;  %v870_v6 = vmul.f32 %v2513_v42, %v3366_v4 }
 0x1d5   : > { %833 = vst.msk [vmem:[#allocation4 + $0x10] sm:$0xff] %vm686_vm0, %v739_v25  ;;  %v748_v26 = vmul.f32 %v2515_v44, %v3517_v18  ;;  %v871_v28 = vmul.f32 %v2515_v44, %v3378_v22  ;;  %v872_v12 = vmul.f32 %v2515_v44, %v3381_v23  ;;  %2526 = vrsqrt.f32 %v3564_v1  ;;  %v663_v41 = vpop.xlane.xlu1 %662  ;;  %v666_v27 = vpop.xlane.xlu0 %665 }
 0x1d6   : > { %v743_v31 = vsel %vm742_vm7, %v3515_v50, %v741_v45  ;;  %901 = vst [vmem:[#allocation2 + $0x30] sm:$0xff] %v869_v13  ;;  %902 = vst [vmem:[#allocation2 + $0x48] sm:$0xff] %v870_v6  ;;  %v682_v3 = vmul.f32 0.00390625, %v660_v54  ;;  %v766_v23 = vand.u32 2147483648, %v3523_v61  ;;  %v3605_v37 = vadd.f32 1e-09, %v681_v53 }
 0x1d7   : > { %v2517_v4 = vpop.eup %2516  ;;  %v746_v16 = vsel %vm744_vm8, %v745_v47, %v743_v31  ;;  %v750_v22 = vsel %vm749_vm9, %v3517_v18, %v748_v26  ;;  %903 = vst [vmem:[#allocation2 + $0x80] sm:$0xff] %v871_v28  ;;  %904 = vst [vmem:[#allocation2 + $0x88] sm:$0xff] %v872_v12  ;;  %v773_v42 = vand.u32 2147483648, %v3535_v17  ;;  %vm784_vm4 = vcmp.eq.f32.partialorder %v3557_v39, inf }
 0x1d8   : > { %v2519_v30 = vpop.eup %2518  ;;  %834 = vst.msk [vmem:[#allocation4 + $0x18] sm:$0xff] %vm686_vm0, %v746_v16  ;;  %v753_v46 = vsel %vm751_vm10, %v752_v36, %v750_v22  ;;  %v755_v50 = vmul.f32 %v2517_v4, %v3521_v60  ;;  %v873_v47 = vmul.f32 %v2517_v4, %v3385_v29  ;;  %v874_v32 = vmul.f32 %v2517_v4, %v3388_v34 }
 0x1d9   : > { %835 = vst.msk [vmem:[#allocation4 + $0x20] sm:$0xff] %vm686_vm0, %v753_v46  ;;  %v762_v33 = vmul.f32 %v2519_v30, %v3523_v61  ;;  %v875_v59 = vmul.f32 %v2519_v30, %v3400_v48  ;;  %v876_v19 = vmul.f32 %v2519_v30, %v3403_v49  ;;  %v3611_v29 = vadd.f32 1e-09, %v682_v3 }
 0x1da   : > { %v757_v18 = vsel %vm756_vm11, %v3521_v60, %v755_v50  ;;  %905 = vst [vmem:[#allocation2 + $0xe8] sm:$0xff] %v873_v47  ;;  %906 = vst [vmem:[#allocation2 + $0xb8] sm:$0xff] %v874_v32  ;;  %v683_v34 = vmul.f32 0.00390625, %v663_v41  ;;  %2528 = vrsqrt.f32 %v3605_v37  ;;  %v684_v49 = vmul.f32 0.00390625, %v666_v27 }
 0x1db   : > { %v2521_v36 = vpop.eup %2520  ;;  %v760_v38 = vsel %vm758_vm12, %v759_v0, %v757_v18  ;;  %v764_v48 = vsel %vm763_vm13, %v3523_v61, %v762_v33  ;;  %907 = vst [vmem:[#allocation2 + $0x60] sm:$0xff] %v875_v59  ;;  %908 = vst [vmem:[#allocation2 + $0xf0] sm:$0xff] %v876_v19  ;;  %2530 = vrsqrt.f32 %v3611_v29  ;;  %vm786_vm5 = vcmp.eq.f32.partialorder %v3557_v39, 0.0 }
 0x1dc   : > { %v2523_v2 = vpop.eup %2522  ;;  %836 = vst.msk [vmem:[#allocation4 + $0x28] sm:$0xff] %vm686_vm0, %v760_v38  ;;  %v767_v24 = vsel %vm765_vm14, %v766_v23, %v764_v48  ;;  %v769_v54 = vmul.f32 %v2521_v36, %v3535_v17  ;;  %v877_v60 = vmul.f32 %v2521_v36, %v3407_v51  ;;  %v878_v0 = vmul.f32 %v2521_v36, %v3410_v56  ;;  %v669_v56 = vpop.xlane.xlu1 %668 }
 0x1dd   : > { %837 = vst.msk [vmem:[#allocation4 + $0x30] sm:$0xff] %vm686_vm0, %v767_v24  ;;  %v776_v55 = vmul.f32 %v2523_v2, %v3539_v52  ;;  %v879_v43 = vmul.f32 %v2523_v2, %v3422_v62  ;;  %v880_v44 = vmul.f32 %v2523_v2, %v3425_v63  ;;  %v780_v51 = vand.u32 2147483648, %v3539_v52 }
 0x1de   : > { %v771_v61 = vsel %vm770_vm15, %v3535_v17, %v769_v54  ;;  %909 = vst [vmem:[#allocation2 + $0x8] sm:$0xff] %v877_v60  ;;  %910 = vst [vmem:[#allocation2 + $0x78] sm:$0xff] %v878_v0  ;;  %v3641_v13 = vadd.f32 1e-09, %v683_v34  ;;  %v3643_v6 = vadd.f32 1e-09, %v684_v49 }
 0x1df   : > { %v774_v25 = vsel %vm772_vm1, %v773_v42, %v771_v61  ;;  %v778_v62 = vsel %vm777_vm2, %v3539_v52, %v776_v55  ;;  %911 = vst [vmem:[#allocation2 + $0x38] sm:$0xff] %v879_v43  ;;  %912 = vst [vmem:[#allocation2 + $0x58] sm:$0xff] %v880_v44  ;;  %v2525_v63 = vpop.eup %2524  ;;  %v685_v12 = vmul.f32 0.00390625, %v669_v56  ;;  %v787_v52 = vand.u32 2147483648, %v3557_v39 }
 0x1e0   : > { %838 = vst.msk [vmem:[#allocation4 + $0x38] sm:$0xff] %vm686_vm0, %v774_v25  ;;  %v781_v45 = vsel %vm779_vm3, %v780_v51, %v778_v62  ;;  %v783_v26 = vmul.f32 %v2525_v63, %v3557_v39  ;;  %v881_v17 = vmul.f32 %v2525_v63, %v3429_v7  ;;  %v882_v28 = vmul.f32 %v2525_v63, %v3432_v10 }
 0x1e1   : > { %839 = vst.msk [vmem:[#allocation4 + $0x40] sm:$0xff] %vm686_vm0, %v781_v45  ;;  %2532 = vrsqrt.f32 %v3641_v13  ;;  %vm791_vm6 = vcmp.eq.f32.partialorder %v3564_v1, inf  ;;  %v794_v16 = vand.u32 2147483648, %v3564_v1  ;;  %v3661_v22 = vadd.f32 1e-09, %v685_v12 }
 0x1e2   : > { %v2527_v53 = vpop.eup %2526  ;;  %v785_v31 = vsel %vm784_vm4, %v3557_v39, %v783_v26  ;;  %913 = vst [vmem:[#allocation2 + $0x40] sm:$0xff] %v881_v17  ;;  %914 = vst [vmem:[#allocation2 + $0xc8] sm:$0xff] %v882_v28  ;;  %2534 = vrsqrt.f32 %v3643_v6  ;;  %vm793_vm7 = vcmp.eq.f32.partialorder %v3564_v1, 0.0  ;;  %vm798_vm8 = vcmp.eq.f32.partialorder %v3605_v37, inf }
 0x1e3   : > { %v788_v3 = vsel %vm786_vm5, %v787_v52, %v785_v31  ;;  %v790_v7 = vmul.f32 %v2527_v53, %v3564_v1  ;;  %v883_v10 = vmul.f32 %v2527_v53, %v3444_v8  ;;  %v884_v4 = vmul.f32 %v2527_v53, %v3447_v9 }
 0x1e4   : > { %840 = vst.msk [vmem:[#allocation4 + $0x48] sm:$0xff] %vm686_vm0, %v788_v3  ;;  %2536 = vrsqrt.f32 %v3661_v22  ;;  %v801_v46 = vand.u32 2147483648, %v3605_v37  ;;  %vm800_vm9 = vcmp.eq.f32.partialorder %v3605_v37, 0.0  ;;  %vm805_vm10 = vcmp.eq.f32.partialorder %v3611_v29, inf }
 0x1e5   : > { %v792_v39 = vsel %vm791_vm6, %v3564_v1, %v790_v7  ;;  %915 = vst [vmem:[#allocation2 + $0xe0] sm:$0xff] %v883_v10  ;;  %916 = vst [vmem:[#allocation2 + $0x90] sm:$0xff] %v884_v4  ;;  %vm807_vm11 = vcmp.eq.f32.partialorder %v3611_v29, 0.0  ;;  %vm812_vm12 = vcmp.eq.f32.partialorder %v3641_v13, inf  ;;  %v815_v34 = vand.u32 2147483648, %v3641_v13 }
 0x1e6   : > { %v795_v23 = vsel %vm793_vm7, %v794_v16, %v792_v39  ;;  %vm814_vm13 = vcmp.eq.f32.partialorder %v3641_v13, 0.0  ;;  %vm819_vm14 = vcmp.eq.f32.partialorder %v3643_v6, inf  ;;  %vm821_vm15 = vcmp.eq.f32.partialorder %v3643_v6, 0.0 }
 0x1e7   : > { %v2529_v8 = vpop.eup %2528  ;;  %841 = vst.msk [vmem:[#allocation4 + $0x50] sm:$0xff] %vm686_vm0, %v795_v23  ;;  %vm826_vm1 = vcmp.eq.f32.partialorder %v3661_v22, inf  ;;  %v829_v60 = vand.u32 2147483648, %v3661_v22  ;;  %vm828_vm2 = vcmp.eq.f32.partialorder %v3661_v22, 0.0 }
 0x1e8   : > { %v797_v9 = vmul.f32 %v2529_v8, %v3605_v37  ;;  %v885_v41 = vmul.f32 %v2529_v8, %v3451_v35  ;;  %v886_v30 = vmul.f32 %v2529_v8, %v3454_v40  ;;  %v2531_v50 = vpop.eup %2530  ;;  %v808_v40 = vand.u32 2147483648, %v3611_v29 }
 0x1e9   : > { %v804_v32 = vmul.f32 %v2531_v50, %v3611_v29  ;;  %v887_v27 = vmul.f32 %v2531_v50, %v3466_v14  ;;  %v888_v35 = vmul.f32 %v2531_v50, %v3469_v15 }
 0x1ea   : > { %v799_v1 = vsel %vm798_vm8, %v3605_v37, %v797_v9  ;;  %917 = vst [vmem:[#allocation2 + $0x70] sm:$0xff] %v885_v41  ;;  %918 = vst [vmem:[#allocation2 + $0xc0] sm:$0xff] %v886_v30 }
 0x1eb   : > { %v802_v47 = vsel %vm800_vm9, %v801_v46, %v799_v1  ;;  %v806_v33 = vsel %vm805_vm10, %v3611_v29, %v804_v32  ;;  %919 = vst [vmem:[#allocation2 + $0xa8] sm:$0xff] %v887_v27  ;;  %920 = vst [vmem:[#allocation2 + $0xd0] sm:$0xff] %v888_v35 }
 0x1ec   : > { %842 = vst.msk [vmem:[#allocation4 + $0x58] sm:$0xff] %vm686_vm0, %v802_v47  ;;  %v809_v19 = vsel %vm807_vm11, %v808_v40, %v806_v33 }
 0x1ed   : > { %843 = vst.msk [vmem:[#allocation4 + $0x60] sm:$0xff] %vm686_vm0, %v809_v19 }
 0x1ee   : > { %v2533_v59 = vpop.eup %2532 }
 0x1ef   : > { %v2535_v37 = vpop.eup %2534  ;;  %v811_v14 = vmul.f32 %v2533_v59, %v3641_v13  ;;  %v889_v15 = vmul.f32 %v2533_v59, %v3473_v57  ;;  %v890_v18 = vmul.f32 %v2533_v59, %v3476_v58  ;;  %v822_v57 = vand.u32 2147483648, %v3643_v6 }
 0x1f0   : > { %v818_v36 = vmul.f32 %v2535_v37, %v3643_v6  ;;  %v891_v29 = vmul.f32 %v2535_v37, %v3488_v20  ;;  %v892_v38 = vmul.f32 %v2535_v37, %v3491_v21 }
 0x1f1   : > { %v813_v48 = vsel %vm812_vm12, %v3641_v13, %v811_v14  ;;  %921 = vst [vmem:[#allocation2 + $0x10] sm:$0xff] %v889_v15  ;;  %922 = vst [vmem:[#allocation2 + $0x28] sm:$0xff] %v890_v18  ;;  %v2537_v20 = vpop.eup %2536 }
 0x1f2   : > { %v816_v49 = vsel %vm814_vm13, %v815_v34, %v813_v48  ;;  %v820_v58 = vsel %vm819_vm14, %v3643_v6, %v818_v36  ;;  %923 = vst [vmem:[#allocation2 + $0xa0] sm:$0xff] %v891_v29  ;;  %924 = vst [vmem:[#allocation2 + $0xf8] sm:$0xff] %v892_v38  ;;  %v825_v2 = vmul.f32 %v2537_v20, %v3661_v22 }
 0x1f3   : > { %844 = vst.msk [vmem:[#allocation4 + $0x68] sm:$0xff] %vm686_vm0, %v816_v49  ;;  %v823_v21 = vsel %vm821_vm15, %v822_v57, %v820_v58  ;;  %v893_v24 = vmul.f32 %v2537_v20, %v3495_v11  ;;  %v894_v54 = vmul.f32 %v2537_v20, %v3498_v5 }
 0x1f4   : > { %845 = vst.msk [vmem:[#allocation4 + $0x70] sm:$0xff] %vm686_vm0, %v823_v21  ;;  %v827_v0 = vsel %vm826_vm1, %v3661_v22, %v825_v2 }
 0x1f5   : > { %925 = vst [vmem:[#allocation2 + $0x20] sm:$0xff] %v893_v24  ;;  %926 = vst [vmem:[#allocation2 + $0x98] sm:$0xff] %v894_v54  ;;  %v830_v42 = vsel %vm828_vm2, %v829_v60, %v827_v0 }
 0x1f6   : > { %846 = vst.msk [vmem:[#allocation4 + $0x78] sm:$0xff] %vm686_vm0, %v830_v42 }
 0x1f7 PF: > { %v1022_v11 = vld [vmem:[%s3181_s29 + $0xf8] sm:$0xff]  ;;  %v1021_v5 = vld [vmem:[%s3181_s29 + $0xf0] sm:$0xff]  ;;  %v1020_v55 = vld [vmem:[%s3181_s29 + $0xe8] sm:$0xff]  ;;  %s4308_s18 = sld [smem:[#allocation28_spill]] }
 0x1f8   : > { %1067 = vmatprep.subr.mxu0 %v1022_v11  ;;  %v1019_v43 = vld [vmem:[%s3181_s29 + $0xe0] sm:$0xff]  ;;  %v1018_v44 = vld [vmem:[%s3181_s29 + $0xd8] sm:$0xff]  ;;  %v1017_v61 = vld [vmem:[%s3181_s29 + $0xd0] sm:$0xff] }
 0x1f9   : > { %1068 = vmatpush1.msra.mxu0 %v1021_v5  ;;  %v1016_v51 = vld [vmem:[%s3181_s29 + $0xc8] sm:$0xff]  ;;  %v1015_v56 = vld [vmem:[%s3181_s29 + $0xc0] sm:$0xff]  ;;  %v1014_v25 = vld [vmem:[%s3181_s29 + $0xb8] sm:$0xff] }
 0x1fa   : > { %1069 = vmatprep.subr.mxu0 %v1020_v55  ;;  %v1013_v62 = vld [vmem:[%s3181_s29 + $0xb0] sm:$0xff]  ;;  %v1012_v63 = vld [vmem:[%s3181_s29 + $0xa8] sm:$0xff]  ;;  %v1011_v45 = vld [vmem:[%s3181_s29 + $0xa0] sm:$0xff] }
 0x1fb   : > { %1070 = vmatpush1.msra.mxu0 %v1019_v43  ;;  %v1010_v13 = vld [vmem:[%s3181_s29 + $0x98] sm:$0xff]  ;;  %v1009_v6 = vld [vmem:[%s3181_s29 + $0x90] sm:$0xff]  ;;  %v1008_v26 = vld [vmem:[%s3181_s29 + $0x88] sm:$0xff] }
 0x1fc   : > { %1071 = vmatprep.subr.mxu0 %v1018_v44  ;;  %v1007_v17 = vld [vmem:[%s3181_s29 + $0x80] sm:$0xff]  ;;  %v1006_v28 = vld [vmem:[%s3181_s29 + $0x78] sm:$0xff]  ;;  %v1005_v12 = vld [vmem:[%s3181_s29 + $0x70] sm:$0xff] }
 0x1fd   : > { %1072 = vmatpush1.msra.mxu0 %v1017_v61  ;;  %v1004_v52 = vld [vmem:[%s3181_s29 + $0x68] sm:$0xff]  ;;  %v1003_v53 = vld [vmem:[%s3181_s29 + $0x60] sm:$0xff]  ;;  %v1002_v31 = vld [vmem:[%s3181_s29 + $0x58] sm:$0xff]  ;;  %p2320_p1 = scmp.ne.s32.totalorder %s4308_s18, 1 }
 0x1fe   : > { %1073 = vmatprep.subr.mxu0 %v1016_v51  ;;  %v1001_v3 = vld [vmem:[%s3181_s29 + $0x50] sm:$0xff]  ;;  %v1000_v7 = vld [vmem:[%s3181_s29 + $0x48] sm:$0xff]  ;;  %v999_v10 = vld [vmem:[%s3181_s29 + $0x40] sm:$0xff]  ;;  %s4309_s10 = sld [smem:[#allocation41_spill]] (!%p2320_p1) }
 0x1ff   : > { %1074 = vmatpush1.msra.mxu0 %v1015_v56  ;;  %v960_v4 = vld [vmem:[#allocation2] sm:$0xff]  ;;  %v998_v16 = vld [vmem:[%s3181_s29 + $0x38] sm:$0xff]  ;;  %v997_v22 = vld [vmem:[%s3181_s29 + $0x30] sm:$0xff] }
 0x200   : > { %1075 = vmatprep.subr.mxu0 %v1014_v25  ;;  %1131 = vmatprep.mubr.f32.mxu0 %v960_v4  ;;  %v996_v39 = vld [vmem:[%s3181_s29 + $0x28] sm:$0xff]  ;;  %v995_v23 = vld [vmem:[%s3181_s29 + $0x20] sm:$0xff]  ;;  %v994_v8 = vld [vmem:[%s3181_s29 + $0x18] sm:$0xff] }
 0x201   : > { %1076 = vmatpush1.msra.mxu0 %v1013_v62  ;;  %v993_v9 = vld [vmem:[%s3181_s29 + $0x10] sm:$0xff]  ;;  %v992_v41 = vld [vmem:[%s3181_s29 + $0x8] sm:$0xff]  ;;  %v991_v30 = vld [vmem:[%s3181_s29] sm:$0xff] }
 0x202   : > { %1077 = vmatprep.subr.mxu0 %v1012_v63  ;;  %v1054_v46 = vld [vmem:[%s3181_s29 + $0x1f8] sm:$0xff]  ;;  %v1053_v50 = vld [vmem:[%s3181_s29 + $0x1f0] sm:$0xff]  ;;  %v1052_v1 = vld [vmem:[%s3181_s29 + $0x1e8] sm:$0xff] }
 0x203   : > { %1078 = vmatpush1.msra.mxu0 %v1011_v45  ;;  %v1323_v47 = vld [vmem:[%s3189_s7 + $0xf8] sm:$0xff]  ;;  %v1322_v32 = vld [vmem:[%s3189_s7 + $0xf0] sm:$0xff]  ;;  %v1321_v27 = vld [vmem:[%s3189_s7 + $0xe8] sm:$0xff] }
 0x204   : > { %1079 = vmatprep.subr.mxu0 %v1010_v13  ;;  %v1051_v35 = vld [vmem:[%s3181_s29 + $0x1e0] sm:$0xff]  ;;  %1356 = vmatprep.subr.mxu1 %v1323_v47  ;;  %v1050_v33 = vld [vmem:[%s3181_s29 + $0x1d8] sm:$0xff]  ;;  %v1049_v19 = vld [vmem:[%s3181_s29 + $0x1d0] sm:$0xff] }
 0x205   : > { %1080 = vmatpush1.msra.mxu0 %v1009_v6  ;;  %v1320_v40 = vld [vmem:[%s3189_s7 + $0xe0] sm:$0xff]  ;;  %1357 = vmatpush1.msra.mxu1 %v1322_v32  ;;  %v1319_v59 = vld [vmem:[%s3189_s7 + $0xd8] sm:$0xff]  ;;  %v1318_v37 = vld [vmem:[%s3189_s7 + $0xd0] sm:$0xff] }
 0x206   : > { %1081 = vmatprep.subr.mxu0 %v1008_v26  ;;  %1358 = vmatprep.subr.mxu1 %v1321_v27  ;;  %v1048_v14 = vld [vmem:[%s3181_s29 + $0x1c8] sm:$0xff]  ;;  %v1047_v18 = vld [vmem:[%s3181_s29 + $0x1c0] sm:$0xff]  ;;  %v1046_v36 = vld [vmem:[%s3181_s29 + $0x1b8] sm:$0xff] }
 0x207   : > { %1082 = vmatpush1.msra.mxu0 %v1007_v17  ;;  %1359 = vmatpush1.msra.mxu1 %v1320_v40  ;;  %v1317_v15 = vld [vmem:[%s3189_s7 + $0xc8] sm:$0xff]  ;;  %v1316_v34 = vld [vmem:[%s3189_s7 + $0xc0] sm:$0xff]  ;;  %v1315_v29 = vld [vmem:[%s3189_s7 + $0xb8] sm:$0xff] }
 0x208   : > { %1083 = vmatprep.subr.mxu0 %v1006_v28  ;;  %1360 = vmatprep.subr.mxu1 %v1319_v59  ;;  %v1045_v38 = vld [vmem:[%s3181_s29 + $0x1b0] sm:$0xff]  ;;  %v1044_v57 = vld [vmem:[%s3181_s29 + $0x1a8] sm:$0xff]  ;;  %v1043_v58 = vld [vmem:[%s3181_s29 + $0x1a0] sm:$0xff] }
 0x209   : > { %1084 = vmatpush1.msra.mxu0 %v1005_v12  ;;  %1361 = vmatpush1.msra.mxu1 %v1318_v37  ;;  %v1314_v48 = vld [vmem:[%s3189_s7 + $0xb0] sm:$0xff]  ;;  %v1313_v49 = vld [vmem:[%s3189_s7 + $0xa8] sm:$0xff]  ;;  %v1312_v20 = vld [vmem:[%s3189_s7 + $0xa0] sm:$0xff] }
 0x20a   : > { %1085 = vmatprep.subr.mxu0 %v1004_v52  ;;  %1362 = vmatprep.subr.mxu1 %v1317_v15  ;;  %v1042_v21 = vld [vmem:[%s3181_s29 + $0x198] sm:$0xff]  ;;  %v1041_v24 = vld [vmem:[%s3181_s29 + $0x190] sm:$0xff]  ;;  %v1040_v60 = vld [vmem:[%s3181_s29 + $0x188] sm:$0xff] }
 0x20b   : > { %1086 = vmatpush1.msra.mxu0 %v1003_v53  ;;  %1363 = vmatpush1.msra.mxu1 %v1316_v34  ;;  %v1311_v2 = vld [vmem:[%s3189_s7 + $0x98] sm:$0xff]  ;;  %v1310_v54 = vld [vmem:[%s3189_s7 + $0x90] sm:$0xff]  ;;  %v1309_v0 = vld [vmem:[%s3189_s7 + $0x88] sm:$0xff] }
 0x20c   : > { %1087 = vmatprep.subr.mxu0 %v1002_v31  ;;  %1364 = vmatprep.subr.mxu1 %v1315_v29  ;;  %v1039_v42 = vld [vmem:[%s3181_s29 + $0x180] sm:$0xff]  ;;  %v1038_v5 = vld [vmem:[%s3181_s29 + $0x178] sm:$0xff]  ;;  %v1037_v43 = vld [vmem:[%s3181_s29 + $0x170] sm:$0xff] }
 0x20d   : > { %1088 = vmatpush1.msra.mxu0 %v1001_v3  ;;  %1365 = vmatpush1.msra.mxu1 %v1314_v48  ;;  %v1308_v11 = vld [vmem:[%s3189_s7 + $0x80] sm:$0xff]  ;;  %v1307_v55 = vld [vmem:[%s3189_s7 + $0x78] sm:$0xff]  ;;  %v1306_v44 = vld [vmem:[%s3189_s7 + $0x70] sm:$0xff] }
 0x20e   : > { %1089 = vmatprep.subr.mxu0 %v1000_v7  ;;  %1366 = vmatprep.subr.mxu1 %v1313_v49  ;;  %v1036_v61 = vld [vmem:[%s3181_s29 + $0x168] sm:$0xff]  ;;  %v1035_v56 = vld [vmem:[%s3181_s29 + $0x160] sm:$0xff]  ;;  %v1034_v62 = vld [vmem:[%s3181_s29 + $0x158] sm:$0xff] }
 0x20f   : > { %1090 = vmatpush1.msra.mxu0 %v999_v10  ;;  %1367 = vmatpush1.msra.mxu1 %v1312_v20  ;;  %v1305_v51 = vld [vmem:[%s3189_s7 + $0x68] sm:$0xff]  ;;  %v1304_v25 = vld [vmem:[%s3189_s7 + $0x60] sm:$0xff]  ;;  %v1303_v63 = vld [vmem:[%s3189_s7 + $0x58] sm:$0xff] }
 0x210   : > { %1091 = vmatprep.subr.mxu0 %v998_v16  ;;  %1368 = vmatprep.subr.mxu1 %v1311_v2  ;;  %v1033_v45 = vld [vmem:[%s3181_s29 + $0x150] sm:$0xff]  ;;  %v1032_v6 = vld [vmem:[%s3181_s29 + $0x148] sm:$0xff]  ;;  %v1031_v17 = vld [vmem:[%s3181_s29 + $0x140] sm:$0xff] }
 0x211   : > { %1092 = vmatpush1.msra.mxu0 %v997_v22  ;;  %1369 = vmatpush1.msra.mxu1 %v1310_v54  ;;  %v1302_v13 = vld [vmem:[%s3189_s7 + $0x50] sm:$0xff]  ;;  %v1301_v26 = vld [vmem:[%s3189_s7 + $0x48] sm:$0xff]  ;;  %v1300_v28 = vld [vmem:[%s3189_s7 + $0x40] sm:$0xff] }
 0x212   : > { %1093 = vmatprep.subr.mxu0 %v996_v39  ;;  %1370 = vmatprep.subr.mxu1 %v1309_v0  ;;  %v1030_v12 = vld [vmem:[%s3181_s29 + $0x138] sm:$0xff]  ;;  %v1029_v53 = vld [vmem:[%s3181_s29 + $0x130] sm:$0xff]  ;;  %v1028_v3 = vld [vmem:[%s3181_s29 + $0x128] sm:$0xff] }
 0x213   : > { %1094 = vmatpush1.msra.mxu0 %v995_v23  ;;  %1371 = vmatpush1.msra.mxu1 %v1308_v11  ;;  %v1299_v52 = vld [vmem:[%s3189_s7 + $0x38] sm:$0xff]  ;;  %v1298_v31 = vld [vmem:[%s3189_s7 + $0x30] sm:$0xff]  ;;  %v1297_v7 = vld [vmem:[%s3189_s7 + $0x28] sm:$0xff] }
 0x214   : > { %1095 = vmatprep.subr.mxu0 %v994_v8  ;;  %1372 = vmatprep.subr.mxu1 %v1307_v55  ;;  %v1027_v10 = vld [vmem:[%s3181_s29 + $0x120] sm:$0xff]  ;;  %v1026_v16 = vld [vmem:[%s3181_s29 + $0x118] sm:$0xff]  ;;  %v1025_v39 = vld [vmem:[%s3181_s29 + $0x110] sm:$0xff] }
 0x215   : > { %1096 = vmatpush1.msra.mxu0 %v993_v9  ;;  %1373 = vmatpush1.msra.mxu1 %v1306_v44  ;;  %v1296_v4 = vld [vmem:[%s3189_s7 + $0x20] sm:$0xff]  ;;  %v1295_v22 = vld [vmem:[%s3189_s7 + $0x18] sm:$0xff]  ;;  %v1294_v23 = vld [vmem:[%s3189_s7 + $0x10] sm:$0xff] }
 0x216   : > { %1097 = vmatprep.subr.mxu0 %v992_v41  ;;  %1374 = vmatprep.subr.mxu1 %v1305_v51  ;;  %v1024_v8 = vld [vmem:[%s3181_s29 + $0x108] sm:$0xff]  ;;  %v1023_v41 = vld [vmem:[%s3181_s29 + $0x100] sm:$0xff]  ;;  %v1354_v47 = vld [vmem:[%s3189_s7 + $0x1f0] sm:$0xff] }
 0x217   : > { %1098 = vmatpush1.msra.mxu0 %v991_v30  ;;  %1375 = vmatpush1.msra.mxu1 %v1304_v25  ;;  %v1293_v9 = vld [vmem:[%s3189_s7 + $0x8] sm:$0xff]  ;;  %v1292_v30 = vld [vmem:[%s3189_s7] sm:$0xff]  ;;  %v1351_v40 = vld [vmem:[%s3189_s7 + $0x1d8] sm:$0xff] }
 0x218   : > { %1099 = vmatprep.subr.mxu0 %v1054_v46  ;;  %1376 = vmatprep.subr.mxu1 %v1303_v63  ;;  %v959_v46 = vld [vmem:[#allocation2 + $0xb0] sm:$0xff]  ;;  %v1352_v27 = vld [vmem:[%s3189_s7 + $0x1e0] sm:$0xff]  ;;  %v1347_v15 = vld [vmem:[%s3189_s7 + $0x1b8] sm:$0xff] }
 0x219   : > { %1100 = vmatpush2.msra.mxu0 %v1053_v50  ;;  %1377 = vmatpush1.msra.mxu1 %v1302_v13  ;;  %v1355_v50 = vld [vmem:[%s3189_s7 + $0x1f8] sm:$0xff]  ;;  %v1353_v32 = vld [vmem:[%s3189_s7 + $0x1e8] sm:$0xff]  ;;  %v1350_v59 = vld [vmem:[%s3189_s7 + $0x1d0] sm:$0xff] }
 0x21a   : > { %1101 = vmatprep.subr.mxu0 %v1052_v1  ;;  %1378 = vmatprep.subr.mxu1 %v1301_v26  ;;  %v962_v1 = vld [vmem:[#allocation2 + $0x18] sm:$0xff]  ;;  %v1348_v37 = vld [vmem:[%s3189_s7 + $0x1c0] sm:$0xff]  ;;  %v980_v13 = vld [vmem:[#allocation2 + $0x90] sm:$0xff] }
 0x21b   : > { %1102 = vmatpush2.msra.mxu0 %v1051_v35  ;;  %1379 = vmatpush1.msra.mxu1 %v1300_v28  ;;  %v961_v35 = vld [vmem:[#allocation2 + $0xd8] sm:$0xff]  ;;  %v1344_v29 = vld [vmem:[%s3189_s7 + $0x1a0] sm:$0xff]  ;;  %v984_v28 = vld [vmem:[#allocation2 + $0xd0] sm:$0xff] }
 0x21c   : > { %1103 = vmatprep.subr.mxu0 %v1050_v33  ;;  %1380 = vmatprep.subr.mxu1 %v1299_v52  ;;  %v964_v33 = vld [vmem:[#allocation2 + $0x68] sm:$0xff]  ;;  %v1346_v34 = vld [vmem:[%s3189_s7 + $0x1b0] sm:$0xff]  ;;  %v1343_v48 = vld [vmem:[%s3189_s7 + $0x198] sm:$0xff] }
 0x21d   : > { %1104 = vmatpush2.msra.mxu0 %v1049_v19  ;;  %1381 = vmatpush1.msra.mxu1 %v1298_v31  ;;  %v1349_v19 = vld [vmem:[%s3189_s7 + $0x1c8] sm:$0xff]  ;;  %v1342_v49 = vld [vmem:[%s3189_s7 + $0x190] sm:$0xff]  ;;  %v1340_v20 = vld [vmem:[%s3189_s7 + $0x180] sm:$0xff] }
 0x21e   : > { %1105 = vmatprep.subr.mxu0 %v1048_v14  ;;  %1382 = vmatprep.subr.mxu1 %v1297_v7  ;;  %v963_v14 = vld [vmem:[#allocation2 + $0x50] sm:$0xff]  ;;  %v1339_v2 = vld [vmem:[%s3189_s7 + $0x178] sm:$0xff]  ;;  %v1336_v0 = vld [vmem:[%s3189_s7 + $0x160] sm:$0xff] }
 0x21f   : > { %1106 = vmatpush2.msra.mxu0 %v1047_v18  ;;  %1383 = vmatpush1.msra.mxu1 %v1296_v4  ;;  %v966_v18 = vld [vmem:[#allocation2 + $0x48] sm:$0xff]  ;;  %v1338_v54 = vld [vmem:[%s3189_s7 + $0x170] sm:$0xff]  ;;  %v1335_v11 = vld [vmem:[%s3189_s7 + $0x158] sm:$0xff] }
 0x220   : > { %1107 = vmatprep.subr.mxu0 %v1046_v36  ;;  %1384 = vmatprep.subr.mxu1 %v1295_v22  ;;  %v1345_v36 = vld [vmem:[%s3189_s7 + $0x1a8] sm:$0xff]  ;;  %v1334_v55 = vld [vmem:[%s3189_s7 + $0x150] sm:$0xff]  ;;  %v1332_v44 = vld [vmem:[%s3189_s7 + $0x140] sm:$0xff] }
 0x221   : > { %1108 = vmatpush2.msra.mxu0 %v1045_v38  ;;  %1385 = vmatpush1.msra.mxu1 %v1294_v23  ;;  %v965_v38 = vld [vmem:[#allocation2 + $0x30] sm:$0xff]  ;;  %v974_v51 = vld [vmem:[#allocation2 + $0x78] sm:$0xff]  ;;  %v978_v63 = vld [vmem:[#allocation2 + $0xc8] sm:$0xff] }
 0x222   : > { %1109 = vmatprep.subr.mxu0 %v1044_v57  ;;  %1386 = vmatprep.subr.mxu1 %v1293_v9  ;;  %v968_v57 = vld [vmem:[#allocation2 + $0x88] sm:$0xff]  ;;  %v976_v25 = vld [vmem:[#allocation2 + $0x58] sm:$0xff]  ;;  %v982_v26 = vld [vmem:[#allocation2 + $0xc0] sm:$0xff] }
 0x223   : > { %1110 = vmatpush2.msra.mxu0 %v1043_v58  ;;  %1387 = vmatpush1.msra.mxu1 %v1292_v30  ;;  %v1341_v58 = vld [vmem:[%s3189_s7 + $0x188] sm:$0xff]  ;;  %v988_v31 = vld [vmem:[#allocation2 + $0xf8] sm:$0xff]  ;;  %v1057_v30 = vlaneseq }
 0x224   : > { %1111 = vmatprep.subr.mxu0 %v1042_v21  ;;  %1388 = vmatprep.subr.mxu1 %v1355_v50  ;;  %v967_v21 = vld [vmem:[#allocation2 + $0x80] sm:$0xff]  ;;  %v986_v52 = vld [vmem:[#allocation2 + $0x28] sm:$0xff]  ;;  %v990_v7 = vld [vmem:[#allocation2 + $0x98] sm:$0xff] }
 0x225   : > { %1112 = vmatpush2.msra.mxu0 %v1041_v24  ;;  %1389 = vmatpush2.msra.mxu1 %v1354_v47  ;;  %v970_v24 = vld [vmem:[#allocation2 + $0xb8] sm:$0xff]  ;;  %v1329_v22 = vld [vmem:[%s3189_s7 + $0x128] sm:$0xff] }
 0x226   : > { %1113 = vmatprep.subr.mxu0 %v1040_v60  ;;  %1390 = vmatprep.subr.mxu1 %v1353_v32  ;;  %v1337_v60 = vld [vmem:[%s3189_s7 + $0x168] sm:$0xff]  ;;  %v1331_v4 = vld [vmem:[%s3189_s7 + $0x138] sm:$0xff] }
 0x227   : > { %1114 = vmatpush2.msra.mxu0 %v1039_v42  ;;  %1391 = vmatpush2.msra.mxu1 %v1352_v27  ;;  %v969_v42 = vld [vmem:[#allocation2 + $0xe8] sm:$0xff]  ;;  %v1327_v23 = vld [vmem:[%s3189_s7 + $0x118] sm:$0xff] }
 0x228   : > { %1115 = vmatprep.subr.mxu0 %v1038_v5  ;;  %1392 = vmatprep.subr.mxu1 %v1351_v40  ;;  %v972_v5 = vld [vmem:[#allocation2 + $0xf0] sm:$0xff] }
 0x229   : > { %1116 = vmatpush2.msra.mxu0 %v1037_v43  ;;  %1393 = vmatpush2.msra.mxu1 %v1350_v59  ;;  %v1333_v43 = vld [vmem:[%s3189_s7 + $0x148] sm:$0xff] }
 0x22a   : > { %1117 = vmatprep.subr.mxu0 %v1036_v61  ;;  %1394 = vmatprep.subr.mxu1 %v1349_v19  ;;  %v971_v61 = vld [vmem:[#allocation2 + $0x60] sm:$0xff]  ;;  %v1325_v9 = vld [vmem:[%s3189_s7 + $0x108] sm:$0xff] }
 0x22b   : > { %1118 = vmatpush2.msra.mxu0 %v1035_v56  ;;  %1395 = vmatpush2.msra.mxu1 %v1348_v37  ;;  %v973_v56 = vld [vmem:[#allocation2 + $0x8] sm:$0xff] }
 0x22c   : > { %1119 = vmatprep.subr.mxu0 %v1034_v62  ;;  %1396 = vmatprep.subr.mxu1 %v1347_v15  ;;  %v975_v62 = vld [vmem:[#allocation2 + $0x38] sm:$0xff] }
 0x22d   : > { %1120 = vmatpush2.msra.mxu0 %v1033_v45  ;;  %1397 = vmatpush2.msra.mxu1 %v1346_v34  ;;  %v977_v45 = vld [vmem:[#allocation2 + $0x40] sm:$0xff] }
 0x22e   : > { %1121 = vmatprep.subr.mxu0 %v1032_v6  ;;  %1398 = vmatprep.subr.mxu1 %v1345_v36  ;;  %v979_v6 = vld [vmem:[#allocation2 + $0xe0] sm:$0xff] }
 0x22f   : > { %1122 = vmatpush2.msra.mxu0 %v1031_v17  ;;  %1399 = vmatpush2.msra.mxu1 %v1344_v29  ;;  %v981_v17 = vld [vmem:[#allocation2 + $0x70] sm:$0xff] }
 0x230   : > { %1123 = vmatprep.subr.mxu0 %v1030_v12  ;;  %1400 = vmatprep.subr.mxu1 %v1343_v48  ;;  %v983_v12 = vld [vmem:[#allocation2 + $0xa8] sm:$0xff] }
 0x231   : > { %1124 = vmatpush2.msra.mxu0 %v1029_v53  ;;  %1401 = vmatpush2.msra.mxu1 %v1342_v49  ;;  %v985_v53 = vld [vmem:[#allocation2 + $0x10] sm:$0xff] }
 0x232   : > { %1125 = vmatprep.subr.mxu0 %v1028_v3  ;;  %1402 = vmatprep.subr.mxu1 %v1341_v58  ;;  %v987_v3 = vld [vmem:[#allocation2 + $0xa0] sm:$0xff] }
 0x233   : > { %1126 = vmatpush2.msra.mxu0 %v1027_v10  ;;  %1403 = vmatpush2.msra.mxu1 %v1340_v20  ;;  %v989_v10 = vld [vmem:[#allocation2 + $0x20] sm:$0xff] }
 0x234   : > { %1127 = vmatprep.subr.mxu0 %v1026_v16  ;;  %1404 = vmatprep.subr.mxu1 %v1339_v2  ;;  %v1330_v16 = vld [vmem:[%s3189_s7 + $0x130] sm:$0xff] }
 0x235   : > { %1128 = vmatpush2.msra.mxu0 %v1025_v39  ;;  %1405 = vmatpush2.msra.mxu1 %v1338_v54  ;;  %v1328_v39 = vld [vmem:[%s3189_s7 + $0x120] sm:$0xff] }
 0x236   : > { %1129 = vmatprep.subr.mxu0 %v1024_v8  ;;  %1406 = vmatprep.subr.mxu1 %v1337_v60  ;;  %v1326_v8 = vld [vmem:[%s3189_s7 + $0x110] sm:$0xff] }
 0x237   : > { %1130 = vmatpush2.msra.mxu0 %v1023_v41  ;;  %1407 = vmatpush2.msra.mxu1 %v1336_v0  ;;  %v1324_v41 = vld [vmem:[%s3189_s7 + $0x100] sm:$0xff] }
 0x238   : > { %1132 = vmatmul.mubr.f32.vlgmr.msra.gmra.mxu0 %v959_v46  ;;  %1408 = vmatprep.subr.mxu1 %v1335_v11  ;;  %v3835_v46 = vshrl.u32 %v1057_v30, 7 }
 0x239   : > { %1137 = vmatprep.mubr.f32.mxu0 %v962_v1  ;;  %1409 = vmatpush2.msra.mxu1 %v1334_v55  ;;  %v1055_v1 = vld [vmem:[%s3187_s11] sm:$0x3] }
 0x23a   : > { %1410 = vmatprep.subr.mxu1 %v1333_v43  ;;  %v1059_v50 = vsub.s32 0, %v3835_v46  ;;  %v1063_v47 = vsub.s32 1, %v3835_v46 }
 0x23b   : > { %1411 = vmatpush2.msra.mxu1 %v1332_v44 }
 0x23c   : > { %1138 = vmatmul.mubr.f32.gmra.mxu0 %v961_v35  ;;  %1412 = vmatprep.subr.mxu1 %v1331_v4  ;;  %v3842_v32 = vrot.slane %v1055_v1, %v1059_v50  ;;  %v3846_v27 = vrot.slane %v1055_v1, %v1063_v47 }
 0x23d   : > { %1143 = vmatprep.mubr.f32.mxu0 %v964_v33  ;;  %1413 = vmatpush2.msra.mxu1 %v1330_v16 }
 0x23e   : > { %1414 = vmatprep.subr.mxu1 %v1329_v22 }
 0x23f   : > { %1415 = vmatpush2.msra.mxu1 %v1328_v39 }
 0x240   : > { %1144 = vmatmul.mubr.f32.gmra.mxu0 %v963_v14  ;;  %1416 = vmatprep.subr.mxu1 %v1327_v23 }
 0x241   : > { %1149 = vmatprep.mubr.f32.mxu0 %v966_v18  ;;  %1417 = vmatpush2.msra.mxu1 %v1326_v8 }
 0x242   : > { %1418 = vmatprep.subr.mxu1 %v1325_v9 }
 0x243   : > { %1419 = vmatpush2.msra.mxu1 %v1324_v41 }
 0x244   : > { %1150 = vmatmul.mubr.f32.gmra.mxu0 %v965_v38 }
 0x245   : > { %1155 = vmatprep.mubr.f32.mxu0 %v968_v57 }
 0x248   : > { %1156 = vmatmul.mubr.f32.gmra.mxu0 %v967_v21 }
 0x249   : > { %1161 = vmatprep.mubr.f32.mxu0 %v970_v24 }
 0x24c   : > { %1162 = vmatmul.mubr.f32.gmra.mxu0 %v969_v42 }
 0x24d   : > { %1167 = vmatprep.mubr.f32.mxu0 %v972_v5 }
 0x250   : > { %1168 = vmatmul.mubr.f32.gmra.mxu0 %v971_v61 }
 0x251   : > { %1173 = vmatprep.mubr.f32.mxu0 %v974_v51 }
 0x254   : > { %1174 = vmatmul.mubr.f32.gmra.mxu0 %v973_v56 }
 0x255   : > { %1179 = vmatprep.mubr.f32.mxu0 %v976_v25 }
 0x258   : > { %1180 = vmatmul.mubr.f32.gmra.mxu0 %v975_v62 }
 0x259   : > { %1185 = vmatprep.mubr.f32.mxu0 %v978_v63 }
 0x25c   : > { %1186 = vmatmul.mubr.f32.gmra.mxu0 %v977_v45 }
 0x25d   : > { %1191 = vmatprep.mubr.f32.mxu0 %v980_v13 }
 0x260   : > { %1192 = vmatmul.mubr.f32.gmra.mxu0 %v979_v6 }
 0x261   : > { %1197 = vmatprep.mubr.f32.mxu0 %v982_v26 }
 0x264   : > { %1198 = vmatmul.mubr.f32.gmra.mxu0 %v981_v17 }
 0x265   : > { %1203 = vmatprep.mubr.f32.mxu0 %v984_v28 }
 0x268   : > { %1204 = vmatmul.mubr.f32.gmra.mxu0 %v983_v12 }
 0x269   : > { %1209 = vmatprep.mubr.f32.mxu0 %v986_v52 }
 0x26c   : > { %1210 = vmatmul.mubr.f32.gmra.mxu0 %v985_v53 }
 0x26d   : > { %1215 = vmatprep.mubr.f32.mxu0 %v988_v31 }
 0x270   : > { %1216 = vmatmul.mubr.f32.gmra.mxu0 %v987_v3 }
 0x271   : > { %1221 = vmatprep.mubr.f32.mxu0 %v990_v7 }
 0x274   : > { %1222 = vmatmul.mubr.f32.gmra.mxu0 %v989_v10 }
 0x2f8   : > { %v1133_v35 = vpop.f32.mrf.mxu0 }
 0x2f9   : > { %v1134_v40 = vadd.f32 %v1133_v35, %v3842_v32 }
 0x2fa   : > { %v1135_v33 = vpop.f32.mrf.mxu0 }
 0x2fb   : > { %v1228_v59 = vmax.f32 %v1134_v40, 0.0  ;;  %1581 = vst [vmem:[%s3198_s13] sm:$0xff] %v1134_v40  ;;  %v1136_v19 = vadd.f32 %v1135_v33, %v3846_v27 }
 0x2fc   : > { %v1139_v37 = vpop.f32.mrf.mxu0 }
 0x2fd   : > { %1613 = vst [vmem:[%s3200_s24] sm:$0xff] %v1228_v59  ;;  %1582 = vst [vmem:[%s3198_s13 + $0x8] sm:$0xff] %v1136_v19  ;;  %v1140_v14 = vadd.f32 %v1139_v37, %v3842_v32  ;;  %v1229_v15 = vmax.f32 %v1136_v19, 0.0 }
 0x2fe   : > { %v1141_v18 = vpop.f32.mrf.mxu0 }
 0x2ff   : > { %v1230_v34 = vmax.f32 %v1140_v14, 0.0  ;;  %1583 = vst [vmem:[%s3198_s13 + $0x10] sm:$0xff] %v1140_v14  ;;  %v1142_v36 = vadd.f32 %v1141_v18, %v3846_v27  ;;  %1420 = vmatprep.mubr.f32.mxu1 %v1229_v15  ;;  %1614 = vst [vmem:[%s3200_s24 + $0x8] sm:$0xff] %v1229_v15 }
 0x300   : > { %v1145_v29 = vpop.f32.mrf.mxu0  ;;  %1421 = vmatmul.mubr.f32.vlgmr.msra.gmra.mxu1 %v1228_v59 }
 0x301   : > { %1615 = vst [vmem:[%s3200_s24 + $0x10] sm:$0xff] %v1230_v34  ;;  %v1231_v38 = vmax.f32 %v1142_v36, 0.0  ;;  %1584 = vst [vmem:[%s3198_s13 + $0x18] sm:$0xff] %v1142_v36  ;;  %v1146_v48 = vadd.f32 %v1145_v29, %v3842_v32 }
 0x302   : > { %v1147_v57 = vpop.f32.mrf.mxu0 }
 0x303   : > { %1616 = vst [vmem:[%s3200_s24 + $0x18] sm:$0xff] %v1231_v38  ;;  %v1232_v49 = vmax.f32 %v1146_v48, 0.0  ;;  %1585 = vst [vmem:[%s3198_s13 + $0x20] sm:$0xff] %v1146_v48  ;;  %v1148_v58 = vadd.f32 %v1147_v57, %v3846_v27  ;;  %1426 = vmatprep.mubr.f32.mxu1 %v1231_v38 }
 0x304   : > { %v1151_v20 = vpop.f32.mrf.mxu0  ;;  %1427 = vmatmul.mubr.f32.gmra.mxu1 %v1230_v34 }
 0x305   : > { %1617 = vst [vmem:[%s3200_s24 + $0x20] sm:$0xff] %v1232_v49  ;;  %v1233_v21 = vmax.f32 %v1148_v58, 0.0  ;;  %1586 = vst [vmem:[%s3198_s13 + $0x28] sm:$0xff] %v1148_v58  ;;  %v1152_v2 = vadd.f32 %v1151_v20, %v3842_v32 }
 0x306   : > { %v1153_v24 = vpop.f32.mrf.mxu0 }
 0x307   : > { %1618 = vst [vmem:[%s3200_s24 + $0x28] sm:$0xff] %v1233_v21  ;;  %v1234_v54 = vmax.f32 %v1152_v2, 0.0  ;;  %1587 = vst [vmem:[%s3198_s13 + $0x30] sm:$0xff] %v1152_v2  ;;  %v1154_v60 = vadd.f32 %v1153_v24, %v3846_v27  ;;  %1432 = vmatprep.mubr.f32.mxu1 %v1233_v21 }
 0x308   : > { %v1157_v0 = vpop.f32.mrf.mxu0  ;;  %1433 = vmatmul.mubr.f32.gmra.mxu1 %v1232_v49 }
 0x309   : > { %1619 = vst [vmem:[%s3200_s24 + $0x30] sm:$0xff] %v1234_v54  ;;  %v1235_v42 = vmax.f32 %v1154_v60, 0.0  ;;  %1588 = vst [vmem:[%s3198_s13 + $0x38] sm:$0xff] %v1154_v60  ;;  %v1158_v11 = vadd.f32 %v1157_v0, %v3842_v32 }
 0x30a   : > { %v1159_v5 = vpop.f32.mrf.mxu0 }
 0x30b   : > { %1620 = vst [vmem:[%s3200_s24 + $0x38] sm:$0xff] %v1235_v42  ;;  %v1236_v55 = vmax.f32 %v1158_v11, 0.0  ;;  %1589 = vst [vmem:[%s3198_s13 + $0x40] sm:$0xff] %v1158_v11  ;;  %v1160_v43 = vadd.f32 %v1159_v5, %v3846_v27  ;;  %1438 = vmatprep.mubr.f32.mxu1 %v1235_v42 }
 0x30c   : > { %v1163_v44 = vpop.f32.mrf.mxu0  ;;  %1439 = vmatmul.mubr.f32.gmra.mxu1 %v1234_v54 }
 0x30d   : > { %1621 = vst [vmem:[%s3200_s24 + $0x40] sm:$0xff] %v1236_v55  ;;  %v1237_v61 = vmax.f32 %v1160_v43, 0.0  ;;  %1590 = vst [vmem:[%s3198_s13 + $0x48] sm:$0xff] %v1160_v43  ;;  %v1164_v51 = vadd.f32 %v1163_v44, %v3842_v32 }
 0x30e   : > { %v1165_v56 = vpop.f32.mrf.mxu0 }
 0x30f   : > { %1622 = vst [vmem:[%s3200_s24 + $0x48] sm:$0xff] %v1237_v61  ;;  %v1238_v25 = vmax.f32 %v1164_v51, 0.0  ;;  %1591 = vst [vmem:[%s3198_s13 + $0x50] sm:$0xff] %v1164_v51  ;;  %v1166_v62 = vadd.f32 %v1165_v56, %v3846_v27  ;;  %1444 = vmatprep.mubr.f32.mxu1 %v1237_v61 }
 0x310   : > { %v1169_v63 = vpop.f32.mrf.mxu0  ;;  %1445 = vmatmul.mubr.f32.gmra.mxu1 %v1236_v55 }
 0x311   : > { %1623 = vst [vmem:[%s3200_s24 + $0x50] sm:$0xff] %v1238_v25  ;;  %v1239_v45 = vmax.f32 %v1166_v62, 0.0  ;;  %1592 = vst [vmem:[%s3198_s13 + $0x58] sm:$0xff] %v1166_v62  ;;  %v1170_v13 = vadd.f32 %v1169_v63, %v3842_v32 }
 0x312   : > { %v1171_v6 = vpop.f32.mrf.mxu0 }
 0x313   : > { %1624 = vst [vmem:[%s3200_s24 + $0x58] sm:$0xff] %v1239_v45  ;;  %v1240_v26 = vmax.f32 %v1170_v13, 0.0  ;;  %1593 = vst [vmem:[%s3198_s13 + $0x60] sm:$0xff] %v1170_v13  ;;  %v1172_v17 = vadd.f32 %v1171_v6, %v3846_v27  ;;  %1450 = vmatprep.mubr.f32.mxu1 %v1239_v45  ;;  %v1260_v13 = vld [vmem:[#allocation5 + $0x80] sm:$0xff] }
 0x314   : > { %v1175_v28 = vpop.f32.mrf.mxu0  ;;  %1451 = vmatmul.mubr.f32.gmra.mxu1 %v1238_v25 }
 0x315   : > { %1625 = vst [vmem:[%s3200_s24 + $0x60] sm:$0xff] %v1240_v26  ;;  %v1241_v12 = vmax.f32 %v1172_v17, 0.0  ;;  %1594 = vst [vmem:[%s3198_s13 + $0x68] sm:$0xff] %v1172_v17  ;;  %v1176_v52 = vadd.f32 %v1175_v28, %v3842_v32 }
 0x316   : > { %v1177_v53 = vpop.f32.mrf.mxu0 }
 0x317   : > { %1626 = vst [vmem:[%s3200_s24 + $0x68] sm:$0xff] %v1241_v12  ;;  %v1242_v31 = vmax.f32 %v1176_v52, 0.0  ;;  %1595 = vst [vmem:[%s3198_s13 + $0x70] sm:$0xff] %v1176_v52  ;;  %v1178_v3 = vadd.f32 %v1177_v53, %v3846_v27  ;;  %1456 = vmatprep.mubr.f32.mxu1 %v1241_v12  ;;  %v1263_v53 = vld [vmem:[#allocation5 + $0x78] sm:$0xff] }
 0x318   : > { %v1181_v7 = vpop.f32.mrf.mxu0  ;;  %1457 = vmatmul.mubr.f32.gmra.mxu1 %v1240_v26  ;;  %v1261_v26 = vld [vmem:[#allocation5 + $0xc8] sm:$0xff] }
 0x319   : > { %1627 = vst [vmem:[%s3200_s24 + $0x70] sm:$0xff] %v1242_v31  ;;  %v1243_v10 = vmax.f32 %v1178_v3, 0.0  ;;  %1596 = vst [vmem:[%s3198_s13 + $0x78] sm:$0xff] %v1178_v3  ;;  %v1182_v4 = vadd.f32 %v1181_v7, %v3842_v32  ;;  %v1264_v3 = vld [vmem:[#allocation5 + $0x8] sm:$0xff] }
 0x31a   : > { %v1183_v16 = vpop.f32.mrf.mxu0 }
 0x31b   : > { %1628 = vst [vmem:[%s3200_s24 + $0x78] sm:$0xff] %v1243_v10  ;;  %v1244_v22 = vmax.f32 %v1182_v4, 0.0  ;;  %1597 = vst [vmem:[%s3198_s13 + $0x80] sm:$0xff] %v1182_v4  ;;  %v1184_v39 = vadd.f32 %v1183_v16, %v3846_v27  ;;  %1462 = vmatprep.mubr.f32.mxu1 %v1243_v10  ;;  %v1265_v4 = vld [vmem:[#allocation5 + $0x90] sm:$0xff] }
 0x31c   : > { %v1187_v23 = vpop.f32.mrf.mxu0  ;;  %1463 = vmatmul.mubr.f32.gmra.mxu1 %v1242_v31 }
 0x31d   : > { %1629 = vst [vmem:[%s3200_s24 + $0x80] sm:$0xff] %v1244_v22  ;;  %v1245_v8 = vmax.f32 %v1184_v39, 0.0  ;;  %1598 = vst [vmem:[%s3198_s13 + $0x88] sm:$0xff] %v1184_v39  ;;  %v1188_v9 = vadd.f32 %v1187_v23, %v3842_v32  ;;  %v1266_v39 = vld [vmem:[#allocation5 + $0x58] sm:$0xff] }
 0x31e   : > { %v1189_v41 = vpop.f32.mrf.mxu0 }
 0x31f   : > { %1630 = vst [vmem:[%s3200_s24 + $0x88] sm:$0xff] %v1245_v8  ;;  %v1246_v30 = vmax.f32 %v1188_v9, 0.0  ;;  %1599 = vst [vmem:[%s3198_s13 + $0x90] sm:$0xff] %v1188_v9  ;;  %v1190_v1 = vadd.f32 %v1189_v41, %v3846_v27  ;;  %1468 = vmatprep.mubr.f32.mxu1 %v1245_v8  ;;  %v1267_v9 = vld [vmem:[#allocation5 + $0xa8] sm:$0xff] }
 0x320   : > { %v1193_v35 = vpop.f32.mrf.mxu0  ;;  %1469 = vmatmul.mubr.f32.gmra.mxu1 %v1244_v22 }
 0x321   : > { %1631 = vst [vmem:[%s3200_s24 + $0x90] sm:$0xff] %v1246_v30  ;;  %v1247_v40 = vmax.f32 %v1190_v1, 0.0  ;;  %1600 = vst [vmem:[%s3198_s13 + $0x98] sm:$0xff] %v1190_v1  ;;  %v1194_v33 = vadd.f32 %v1193_v35, %v3842_v32  ;;  %v1268_v1 = vld [vmem:[#allocation5 + $0xd0] sm:$0xff] }
 0x322   : > { %v1195_v59 = vpop.f32.mrf.mxu0 }
 0x323   : > { %1632 = vst [vmem:[%s3200_s24 + $0x98] sm:$0xff] %v1247_v40  ;;  %v1248_v19 = vmax.f32 %v1194_v33, 0.0  ;;  %1601 = vst [vmem:[%s3198_s13 + $0xa0] sm:$0xff] %v1194_v33  ;;  %v1196_v37 = vadd.f32 %v1195_v59, %v3846_v27  ;;  %1474 = vmatprep.mubr.f32.mxu1 %v1247_v40  ;;  %v1269_v33 = vld [vmem:[#allocation5 + $0xb0] sm:$0xff] }
 0x324   : > { %v1199_v14 = vpop.f32.mrf.mxu0  ;;  %1475 = vmatmul.mubr.f32.gmra.mxu1 %v1246_v30 }
 0x325   : > { %1633 = vst [vmem:[%s3200_s24 + $0xa0] sm:$0xff] %v1248_v19  ;;  %v1249_v15 = vmax.f32 %v1196_v37, 0.0  ;;  %1602 = vst [vmem:[%s3198_s13 + $0xa8] sm:$0xff] %v1196_v37  ;;  %v1200_v18 = vadd.f32 %v1199_v14, %v3842_v32  ;;  %v1270_v37 = vld [vmem:[#allocation5 + $0x38] sm:$0xff] }
 0x326   : > { %v1201_v34 = vpop.f32.mrf.mxu0 }
 0x327   : > { %1634 = vst [vmem:[%s3200_s24 + $0xa8] sm:$0xff] %v1249_v15  ;;  %v1250_v36 = vmax.f32 %v1200_v18, 0.0  ;;  %1603 = vst [vmem:[%s3198_s13 + $0xb0] sm:$0xff] %v1200_v18  ;;  %v1202_v29 = vadd.f32 %v1201_v34, %v3846_v27  ;;  %1480 = vmatprep.mubr.f32.mxu1 %v1249_v15  ;;  %v1271_v18 = vld [vmem:[#allocation5 + $0x40] sm:$0xff] }
 0x328   : > { %v1205_v38 = vpop.f32.mrf.mxu0  ;;  %1481 = vmatmul.mubr.f32.gmra.mxu1 %v1248_v19 }
 0x329   : > { %1635 = vst [vmem:[%s3200_s24 + $0xb0] sm:$0xff] %v1250_v36  ;;  %v1251_v48 = vmax.f32 %v1202_v29, 0.0  ;;  %1604 = vst [vmem:[%s3198_s13 + $0xb8] sm:$0xff] %v1202_v29  ;;  %v1206_v57 = vadd.f32 %v1205_v38, %v3842_v32  ;;  %v1272_v29 = vld [vmem:[#allocation5 + $0xe0] sm:$0xff] }
 0x32a   : > { %v1207_v49 = vpop.f32.mrf.mxu0 }
 0x32b   : > { %1636 = vst [vmem:[%s3200_s24 + $0xb8] sm:$0xff] %v1251_v48  ;;  %v1252_v58 = vmax.f32 %v1206_v57, 0.0  ;;  %1605 = vst [vmem:[%s3198_s13 + $0xc0] sm:$0xff] %v1206_v57  ;;  %v1208_v20 = vadd.f32 %v1207_v49, %v3846_v27  ;;  %1486 = vmatprep.mubr.f32.mxu1 %v1251_v48  ;;  %v1273_v57 = vld [vmem:[#allocation5 + $0x60] sm:$0xff] }
 0x32c   : > { %v1211_v21 = vpop.f32.mrf.mxu0  ;;  %1487 = vmatmul.mubr.f32.gmra.mxu1 %v1250_v36 }
 0x32d   : > { %1637 = vst [vmem:[%s3200_s24 + $0xc0] sm:$0xff] %v1252_v58  ;;  %v1253_v2 = vmax.f32 %v1208_v20, 0.0  ;;  %1606 = vst [vmem:[%s3198_s13 + $0xc8] sm:$0xff] %v1208_v20  ;;  %v1212_v24 = vadd.f32 %v1211_v21, %v3842_v32  ;;  %v1274_v20 = vld [vmem:[#allocation5 + $0x18] sm:$0xff] }
 0x32e   : > { %v1213_v54 = vpop.f32.mrf.mxu0 }
 0x32f   : > { %1638 = vst [vmem:[%s3200_s24 + $0xc8] sm:$0xff] %v1253_v2  ;;  %v1254_v60 = vmax.f32 %v1212_v24, 0.0  ;;  %1607 = vst [vmem:[%s3198_s13 + $0xd0] sm:$0xff] %v1212_v24  ;;  %v1214_v0 = vadd.f32 %v1213_v54, %v3846_v27  ;;  %1492 = vmatprep.mubr.f32.mxu1 %v1253_v2  ;;  %v1275_v24 = vld [vmem:[#allocation5 + $0x68] sm:$0xff] }
 0x330   : > { %v1217_v42 = vpop.f32.mrf.mxu0  ;;  %1493 = vmatmul.mubr.f32.gmra.mxu1 %v1252_v58 }
 0x331   : > { %1639 = vst [vmem:[%s3200_s24 + $0xd0] sm:$0xff] %v1254_v60  ;;  %v1255_v11 = vmax.f32 %v1214_v0, 0.0  ;;  %1608 = vst [vmem:[%s3198_s13 + $0xd8] sm:$0xff] %v1214_v0  ;;  %v1218_v5 = vadd.f32 %v1217_v42, %v3842_v32  ;;  %v1276_v0 = vld [vmem:[#allocation5 + $0x10] sm:$0xff] }
 0x332   : > { %v1219_v55 = vpop.f32.mrf.mxu0 }
 0x333   : > { %1640 = vst [vmem:[%s3200_s24 + $0xd8] sm:$0xff] %v1255_v11  ;;  %v1256_v43 = vmax.f32 %v1218_v5, 0.0  ;;  %1609 = vst [vmem:[%s3198_s13 + $0xe0] sm:$0xff] %v1218_v5  ;;  %v1220_v44 = vadd.f32 %v1219_v55, %v3846_v27  ;;  %1498 = vmatprep.mubr.f32.mxu1 %v1255_v11  ;;  %v1277_v5 = vld [vmem:[#allocation5 + $0x70] sm:$0xff] }
 0x334   : > { %v1223_v61 = vpop.f32.mrf.mxu0  ;;  %1499 = vmatmul.mubr.f32.gmra.mxu1 %v1254_v60 }
 0x335   : > { %1641 = vst [vmem:[%s3200_s24 + $0xe0] sm:$0xff] %v1256_v43  ;;  %v1257_v51 = vmax.f32 %v1220_v44, 0.0  ;;  %1610 = vst [vmem:[%s3198_s13 + $0xe8] sm:$0xff] %v1220_v44  ;;  %v1224_v56 = vadd.f32 %v1223_v61, %v3842_v32  ;;  %v1262_v32 = vld [vmem:[#allocation5 + $0xe8] sm:$0xff]  ;;  %v1278_v44 = vld [vmem:[#allocation5 + $0x50] sm:$0xff] }
 0x336   : > { %v1225_v25 = vpop.f32.mrf.mxu0 }
 0x337   : > { %1642 = vst [vmem:[%s3200_s24 + $0xe8] sm:$0xff] %v1257_v51  ;;  %v1258_v62 = vmax.f32 %v1224_v56, 0.0  ;;  %1611 = vst [vmem:[%s3198_s13 + $0xf0] sm:$0xff] %v1224_v56  ;;  %v1226_v63 = vadd.f32 %v1225_v25, %v3846_v27  ;;  %1504 = vmatprep.mubr.f32.mxu1 %v1257_v51  ;;  %v1279_v56 = vld [vmem:[#allocation5 + $0xa0] sm:$0xff] }
 0x338   : > { %1505 = vmatmul.mubr.f32.gmra.mxu1 %v1256_v43 }
 0x339   : > { %1643 = vst [vmem:[%s3200_s24 + $0xf0] sm:$0xff] %v1258_v62  ;;  %v1259_v45 = vmax.f32 %v1226_v63, 0.0  ;;  %1612 = vst [vmem:[%s3198_s13 + $0xf8] sm:$0xff] %v1226_v63  ;;  %v1280_v63 = vld [vmem:[#allocation5 + $0xd8] sm:$0xff] }
 0x33b   : > { %1644 = vst [vmem:[%s3200_s24 + $0xf8] sm:$0xff] %v1259_v45  ;;  %1510 = vmatprep.mubr.f32.mxu1 %v1259_v45 }
 0x33c   : > { %1511 = vmatmul.mubr.f32.gmra.mxu1 %v1258_v62 }
 0x3c0   : > { %v1422_v6 = vpop.f32.mrf.mxu1 }
 0x3c1   : > { %v1517_v17 = vadd.f32 %v1422_v6, %v1260_v13  ;;  %v1281_v6 = vld [vmem:[#allocation5 + $0x30] sm:$0xff] }
 0x3c2   : > { %v1424_v28 = vpop.f32.mrf.mxu1 }
 0x3c3   : > { %1549 = vst [vmem:[#allocation5 + $0x80] sm:$0xff] %v1517_v17  ;;  %v1518_v12 = vadd.f32 %v1424_v28, %v1261_v26  ;;  %v1282_v28 = vld [vmem:[#allocation5 + $0x20] sm:$0xff] }
 0x3c4   : > { %v1428_v52 = vpop.f32.mrf.mxu1 }
 0x3c5   : > { %1550 = vst [vmem:[#allocation5 + $0xc8] sm:$0xff] %v1518_v12  ;;  %v1519_v27 = vadd.f32 %v1428_v52, %v1262_v32  ;;  %v1283_v52 = vld [vmem:[#allocation5 + $0xf0] sm:$0xff] }
 0x3c6   : > { %v1430_v31 = vpop.f32.mrf.mxu1 }
 0x3c7   : > { %1551 = vst [vmem:[#allocation5 + $0xe8] sm:$0xff] %v1519_v27  ;;  %v1520_v7 = vadd.f32 %v1430_v31, %v1263_v53  ;;  %v1284_v31 = vld [vmem:[#allocation5 + $0x88] sm:$0xff] }
 0x3c8   : > { %v1434_v10 = vpop.f32.mrf.mxu1 }
 0x3c9   : > { %1552 = vst [vmem:[#allocation5 + $0x78] sm:$0xff] %v1520_v7  ;;  %v1521_v16 = vadd.f32 %v1434_v10, %v1264_v3  ;;  %v1285_v10 = vld [vmem:[#allocation5 + $0x48] sm:$0xff] }
 0x3ca   : > { %v1436_v22 = vpop.f32.mrf.mxu1 }
 0x3cb   : > { %1553 = vst [vmem:[#allocation5 + $0x8] sm:$0xff] %v1521_v16  ;;  %v1522_v23 = vadd.f32 %v1436_v22, %v1265_v4  ;;  %v1286_v22 = vld [vmem:[#allocation5 + $0xf8] sm:$0xff] }
 0x3cc   : > { %v1440_v8 = vpop.f32.mrf.mxu1 }
 0x3cd   : > { %1554 = vst [vmem:[#allocation5 + $0x90] sm:$0xff] %v1522_v23  ;;  %v1523_v41 = vadd.f32 %v1440_v8, %v1266_v39  ;;  %v1287_v8 = vld [vmem:[#allocation5 + $0xc0] sm:$0xff] }
 0x3ce   : > { %v1442_v30 = vpop.f32.mrf.mxu1 }
 0x3cf   : > { %1555 = vst [vmem:[#allocation5 + $0x58] sm:$0xff] %v1523_v41  ;;  %v1524_v35 = vadd.f32 %v1442_v30, %v1267_v9  ;;  %v1288_v30 = vld [vmem:[#allocation5 + $0xb8] sm:$0xff] }
 0x3d0   : > { %v1446_v40 = vpop.f32.mrf.mxu1 }
 0x3d1   : > { %1556 = vst [vmem:[#allocation5 + $0xa8] sm:$0xff] %v1524_v35  ;;  %v1525_v59 = vadd.f32 %v1446_v40, %v1268_v1  ;;  %v1289_v40 = vld [vmem:[#allocation5] sm:$0xff] }
 0x3d2   : > { %v1448_v19 = vpop.f32.mrf.mxu1 }
 0x3d3   : > { %1557 = vst [vmem:[#allocation5 + $0xd0] sm:$0xff] %v1525_v59  ;;  %v1526_v14 = vadd.f32 %v1448_v19, %v1269_v33  ;;  %v1290_v19 = vld [vmem:[#allocation5 + $0x28] sm:$0xff] }
 0x3d4   : > { %v1452_v15 = vpop.f32.mrf.mxu1 }
 0x3d5   : > { %1558 = vst [vmem:[#allocation5 + $0xb0] sm:$0xff] %v1526_v14  ;;  %v1527_v34 = vadd.f32 %v1452_v15, %v1270_v37  ;;  %v1291_v15 = vld [vmem:[#allocation5 + $0x98] sm:$0xff] }
 0x3d6   : > { %v1454_v36 = vpop.f32.mrf.mxu1 }
 0x3d7   : > { %1559 = vst [vmem:[#allocation5 + $0x38] sm:$0xff] %v1527_v34  ;;  %v1528_v38 = vadd.f32 %v1454_v36, %v1271_v18 }
 0x3d8   : > { %v1458_v48 = vpop.f32.mrf.mxu1 }
 0x3d9   : > { %1560 = vst [vmem:[#allocation5 + $0x40] sm:$0xff] %v1528_v38  ;;  %v1529_v49 = vadd.f32 %v1458_v48, %v1272_v29 }
 0x3da   : > { %v1460_v58 = vpop.f32.mrf.mxu1 }
 0x3db   : > { %1561 = vst [vmem:[#allocation5 + $0xe0] sm:$0xff] %v1529_v49  ;;  %v1530_v21 = vadd.f32 %v1460_v58, %v1273_v57 }
 0x3dc   : > { %v1464_v2 = vpop.f32.mrf.mxu1 }
 0x3dd   : > { %1562 = vst [vmem:[#allocation5 + $0x60] sm:$0xff] %v1530_v21  ;;  %v1531_v54 = vadd.f32 %v1464_v2, %v1274_v20 }
 0x3de   : > { %v1466_v60 = vpop.f32.mrf.mxu1 }
 0x3df   : > { %1563 = vst [vmem:[#allocation5 + $0x18] sm:$0xff] %v1531_v54  ;;  %v1532_v42 = vadd.f32 %v1466_v60, %v1275_v24 }
 0x3e0   : > { %v1470_v11 = vpop.f32.mrf.mxu1 }
 0x3e1   : > { %1564 = vst [vmem:[#allocation5 + $0x68] sm:$0xff] %v1532_v42  ;;  %v1533_v55 = vadd.f32 %v1470_v11, %v1276_v0 }
 0x3e2   : > { %v1472_v43 = vpop.f32.mrf.mxu1 }
 0x3e3   : > { %1565 = vst [vmem:[#allocation5 + $0x10] sm:$0xff] %v1533_v55  ;;  %v1534_v61 = vadd.f32 %v1472_v43, %v1277_v5 }
 0x3e4   : > { %v1476_v51 = vpop.f32.mrf.mxu1 }
 0x3e5   : > { %1566 = vst [vmem:[#allocation5 + $0x70] sm:$0xff] %v1534_v61  ;;  %v1535_v25 = vadd.f32 %v1476_v51, %v1278_v44 }
 0x3e6   : > { %v1478_v62 = vpop.f32.mrf.mxu1 }
 0x3e7   : > { %1567 = vst [vmem:[#allocation5 + $0x50] sm:$0xff] %v1535_v25  ;;  %v1536_v45 = vadd.f32 %v1478_v62, %v1279_v56 }
 0x3e8   : > { %v1482_v13 = vpop.f32.mrf.mxu1 }
 0x3e9   : > { %1568 = vst [vmem:[#allocation5 + $0xa0] sm:$0xff] %v1536_v45  ;;  %v1537_v26 = vadd.f32 %v1482_v13, %v1280_v63 }
 0x3ea   : > { %v1484_v17 = vpop.f32.mrf.mxu1 }
 0x3eb   : > { %1569 = vst [vmem:[#allocation5 + $0xd8] sm:$0xff] %v1537_v26  ;;  %v1538_v32 = vadd.f32 %v1484_v17, %v1281_v6 }
 0x3ec   : > { %v1488_v12 = vpop.f32.mrf.mxu1 }
 0x3ed   : > { %1570 = vst [vmem:[#allocation5 + $0x30] sm:$0xff] %v1538_v32  ;;  %v1539_v53 = vadd.f32 %v1488_v12, %v1282_v28 }
 0x3ee   : > { %v1490_v27 = vpop.f32.mrf.mxu1 }
 0x3ef   : > { %1571 = vst [vmem:[#allocation5 + $0x20] sm:$0xff] %v1539_v53  ;;  %v1540_v3 = vadd.f32 %v1490_v27, %v1283_v52 }
 0x3f0   : > { %v1494_v7 = vpop.f32.mrf.mxu1 }
 0x3f1   : > { %1572 = vst [vmem:[#allocation5 + $0xf0] sm:$0xff] %v1540_v3  ;;  %v1541_v4 = vadd.f32 %v1494_v7, %v1284_v31 }
 0x3f2   : > { %v1496_v16 = vpop.f32.mrf.mxu1 }
 0x3f3   : > { %1573 = vst [vmem:[#allocation5 + $0x88] sm:$0xff] %v1541_v4  ;;  %v1542_v39 = vadd.f32 %v1496_v16, %v1285_v10 }
 0x3f4   : > { %v1500_v23 = vpop.f32.mrf.mxu1 }
 0x3f5   : > { %1574 = vst [vmem:[#allocation5 + $0x48] sm:$0xff] %v1542_v39  ;;  %v1543_v9 = vadd.f32 %v1500_v23, %v1286_v22 }
 0x3f6   : > { %v1502_v41 = vpop.f32.mrf.mxu1 }
 0x3f7   : > { %1575 = vst [vmem:[#allocation5 + $0xf8] sm:$0xff] %v1543_v9  ;;  %v1544_v1 = vadd.f32 %v1502_v41, %v1287_v8 }
 0x3f8   : > { %v1506_v35 = vpop.f32.mrf.mxu1 }
 0x3f9   : > { %1576 = vst [vmem:[#allocation5 + $0xc0] sm:$0xff] %v1544_v1  ;;  %v1545_v33 = vadd.f32 %v1506_v35, %v1288_v30 }
 0x3fa   : > { %v1508_v59 = vpop.f32.mrf.mxu1 }
 0x3fb   : > { %1577 = vst [vmem:[#allocation5 + $0xb8] sm:$0xff] %v1545_v33  ;;  %v1546_v37 = vadd.f32 %v1508_v59, %v1289_v40 }
 0x3fc   : > { %v1512_v14 = vpop.f32.mrf.mxu1 }
 0x3fd   : > { %1578 = vst [vmem:[#allocation5] sm:$0xff] %v1546_v37  ;;  %v1547_v18 = vadd.f32 %v1512_v14, %v1290_v19  ;;  %1648 = sbr.rel (%p2320_p1) target bundleno = 1216 (0x4c0), region = 64 }
 0x3fe   : > { %v1514_v34 = vpop.f32.mrf.mxu1 }
 0x3ff   : > { %1579 = vst [vmem:[#allocation5 + $0x28] sm:$0xff] %v1547_v18  ;;  %v1548_v36 = vadd.f32 %v1514_v34, %v1291_v15 }
 0x401   : > { %1580 = vst [vmem:[#allocation5 + $0x98] sm:$0xff] %v1548_v36 }
 0x402   : > { %v1727_v29 = vld [vmem:[#allocation4 + $0x10] sm:$0xff]  ;;  %v1725_v38 = vld [vmem:[#allocation4] sm:$0xff]  ;;  %v2874_v48 = vmov 0   ;;  %v1728_v57 = vld [vmem:[#allocation4 + $0x18] sm:$0xff] }
 0x403   : > { %2539 = vset.pattern.permute.xlu1 %v2874_v48  ;;  %2538 = vset.pattern.permute.xlu0 %v2874_v48  ;;  %v1726_v49 = vld [vmem:[#allocation4 + $0x8] sm:$0xff]  ;;  %v1729_v20 = vld [vmem:[#allocation4 + $0x20] sm:$0xff]  ;;  %v1732_v21 = vld [vmem:[#allocation4 + $0x38] sm:$0xff] }
 0x404   : > { %1753 = vperm.xlu1 %2539, %v1727_v29   ;;  %1743 = vperm.xlu0 %2538, %v1725_v38   ;;  %v1730_v58 = vld [vmem:[#allocation4 + $0x28] sm:$0xff]  ;;  %v1731_v2 = vld [vmem:[#allocation4 + $0x30] sm:$0xff]  ;;  %v1733_v54 = vld [vmem:[#allocation4 + $0x40] sm:$0xff] }
 0x405   : > { %v1734_v24 = vld [vmem:[#allocation4 + $0x48] sm:$0xff]  ;;  %v1736_v60 = vld [vmem:[#allocation4 + $0x58] sm:$0xff]  ;;  %v1735_v0 = vld [vmem:[#allocation4 + $0x50] sm:$0xff] }
 0x406   : > { %v1738_v42 = vld [vmem:[#allocation4 + $0x68] sm:$0xff]  ;;  %v1737_v11 = vld [vmem:[#allocation4 + $0x60] sm:$0xff]  ;;  %v1740_v5 = vld [vmem:[#allocation4 + $0x78] sm:$0xff] }
 0x407   : > { %v1739_v55 = vld [vmem:[#allocation4 + $0x70] sm:$0xff]  ;;  %v1854_v43 = vld [vmem:[#allocation3 + $0x8] sm:$0xff]  ;;  %v1853_v44 = vld [vmem:[#allocation3] sm:$0xff] }
 0x408   : > { %1758 = vperm.xlu1 %2539, %v1728_v57   ;;  %1748 = vperm.xlu0 %2538, %v1726_v49   ;;  %v1856_v61 = vld [vmem:[#allocation3 + $0x18] sm:$0xff]  ;;  %v1855_v51 = vld [vmem:[#allocation3 + $0x10] sm:$0xff]  ;;  %v1858_v56 = vld [vmem:[#allocation3 + $0x28] sm:$0xff] }
 0x409   : > { %v1857_v25 = vld [vmem:[#allocation3 + $0x20] sm:$0xff]  ;;  %v1860_v62 = vld [vmem:[#allocation3 + $0x38] sm:$0xff]  ;;  %v1859_v63 = vld [vmem:[#allocation3 + $0x30] sm:$0xff] }
 0x40a   : > { %v1862_v45 = vld [vmem:[#allocation3 + $0x48] sm:$0xff]  ;;  %v1861_v13 = vld [vmem:[#allocation3 + $0x40] sm:$0xff]  ;;  %v1864_v6 = vld [vmem:[#allocation3 + $0x58] sm:$0xff] }
 0x40b   : > { %v1863_v26 = vld [vmem:[#allocation3 + $0x50] sm:$0xff]  ;;  %v1866_v17 = vld [vmem:[#allocation3 + $0x68] sm:$0xff]  ;;  %v1865_v28 = vld [vmem:[#allocation3 + $0x60] sm:$0xff] }
 0x40c   : > { %1768 = vperm.xlu1 %2539, %v1730_v58   ;;  %1763 = vperm.xlu0 %2538, %v1729_v20   ;;  %v1868_v32 = vld [vmem:[#allocation3 + $0x78] sm:$0xff]  ;;  %v1867_v12 = vld [vmem:[#allocation3 + $0x70] sm:$0xff]  ;;  %v1681_v39 = vld [vmem:[%s4309_s10] sm:$0x3] }
 0x40d   : > { %v3966_v9 = vrot.slane %v1681_v39, %v1059_v50  ;;  %v3970_v41 = vrot.slane %v1681_v39, %v1063_v47  ;;  %v1649_v30 = vld [vmem:[#allocation5 + $0x80] sm:$0xff]  ;;  %v1650_v1 = vld [vmem:[#allocation5 + $0xc8] sm:$0xff]  ;;  %v1652_v40 = vld [vmem:[#allocation5 + $0x78] sm:$0xff] }
 0x40e   : > { %v1651_v35 = vld [vmem:[#allocation5 + $0xe8] sm:$0xff]  ;;  %v1654_v37 = vld [vmem:[#allocation5 + $0x90] sm:$0xff]  ;;  %v1655_v50 = vld [vmem:[#allocation5 + $0x58] sm:$0xff] }
 0x40f   : > { %v1653_v19 = vld [vmem:[#allocation5 + $0x8] sm:$0xff]  ;;  %v1693_v14 = vadd.f32 %v3966_v9, %v1649_v30  ;;  %v1694_v15 = vadd.f32 %v3970_v41, %v1650_v1  ;;  %v1695_v46 = vadd.f32 %v3966_v9, %v1651_v35  ;;  %v1696_v47 = vadd.f32 %v3970_v41, %v1652_v40  ;;  %v1659_v49 = vld [vmem:[#allocation5 + $0x38] sm:$0xff]  ;;  %v1667_v35 = vld [vmem:[#allocation5 + $0x50] sm:$0xff] }
 0x410   : > { %1778 = vperm.xlu1 %2539, %v1732_v21   ;;  %1773 = vperm.xlu0 %2538, %v1731_v2   ;;  %v1656_v18 = vld [vmem:[#allocation5 + $0xa8] sm:$0xff]  ;;  %v1697_v29 = vadd.f32 %v3966_v9, %v1653_v19  ;;  %v1698_v38 = vadd.f32 %v3970_v41, %v1654_v37  ;;  %v1699_v48 = vadd.f32 %v3966_v9, %v1655_v50  ;;  %v1665_v50 = vld [vmem:[#allocation5 + $0x10] sm:$0xff] }
 0x411   : > { %v1700_v57 = vadd.f32 %v3970_v41, %v1656_v18  ;;  %v1666_v18 = vld [vmem:[#allocation5 + $0x70] sm:$0xff] }
 0x414   : > { %1788 = vperm.xlu1 %2539, %v1734_v24   ;;  %1783 = vperm.xlu0 %2538, %v1733_v54   ;;  %v1660_v24 = vld [vmem:[#allocation5 + $0x40] sm:$0xff]  ;;  %v1657_v54 = vld [vmem:[#allocation5 + $0xd0] sm:$0xff] }
 0x418   : > { %1798 = vperm.xlu1 %2539, %v1736_v60   ;;  %1793 = vperm.xlu0 %2538, %v1735_v0   ;;  %v1658_v60 = vld [vmem:[#allocation5 + $0xb0] sm:$0xff] }
 0x41c   : > { %1808 = vperm.xlu1 %2539, %v1738_v42   ;;  %1803 = vperm.xlu0 %2538, %v1737_v11  }
 0x420   : > { %1818 = vperm.xlu1 %2539, %v1740_v5   ;;  %1813 = vperm.xlu0 %2538, %v1739_v55  }
 0x424   : > { %1876 = vperm.xlu1 %2539, %v1854_v43   ;;  %1871 = vperm.xlu0 %2538, %v1853_v44   ;;  %v1703_v44 = vadd.f32 %v3966_v9, %v1659_v49  ;;  %v1709_v49 = vadd.f32 %v3966_v9, %v1665_v50 }
 0x428   : > { %1886 = vperm.xlu1 %2539, %v1856_v61   ;;  %1881 = vperm.xlu0 %2538, %v1855_v51   ;;  %v1704_v61 = vadd.f32 %v3970_v41, %v1660_v24  ;;  %v1701_v51 = vadd.f32 %v3966_v9, %v1657_v54 }
 0x42c   : > { %1896 = vperm.xlu1 %2539, %v1858_v56   ;;  %1891 = vperm.xlu0 %2538, %v1857_v25   ;;  %v1702_v56 = vadd.f32 %v3970_v41, %v1658_v60  ;;  %v1663_v25 = vld [vmem:[#allocation5 + $0x18] sm:$0xff]  ;;  %v1672_v60 = vld [vmem:[#allocation5 + $0xf0] sm:$0xff] }
 0x430   : > { %1906 = vperm.xlu1 %2539, %v1860_v62   ;;  %1901 = vperm.xlu0 %2538, %v1859_v63  }
 0x434   : > { %1916 = vperm.xlu1 %2539, %v1862_v45   ;;  %1911 = vperm.xlu0 %2538, %v1861_v13  }
 0x438   : > { %1926 = vperm.xlu1 %2539, %v1864_v6   ;;  %1921 = vperm.xlu0 %2538, %v1863_v26   ;;  %v1664_v6 = vld [vmem:[#allocation5 + $0x68] sm:$0xff]  ;;  %v1661_v26 = vld [vmem:[#allocation5 + $0xe0] sm:$0xff] }
 0x439   : > { %v1705_v30 = vadd.f32 %v3966_v9, %v1661_v26  ;;  %v1673_v26 = vld [vmem:[#allocation5 + $0x88] sm:$0xff] }
 0x43c   : > { %1936 = vperm.xlu1 %2539, %v1866_v17   ;;  %1931 = vperm.xlu0 %2538, %v1865_v28   ;;  %v1662_v17 = vld [vmem:[#allocation5 + $0x60] sm:$0xff] }
 0x43d   : > { %v1706_v1 = vadd.f32 %v3970_v41, %v1662_v17  ;;  %v1674_v17 = vld [vmem:[#allocation5 + $0x48] sm:$0xff] }
 0x440   : > { %1946 = vperm.xlu1 %2539, %v1868_v32   ;;  %1941 = vperm.xlu0 %2538, %v1867_v12  }
 0x47f   : > { %v1754_v52 = vpop.permute.xlu1 %1753  ;;  %v1744_v53 = vpop.permute.xlu0 %1743 }
 0x480   : > { %v1821_v58 = vmul.f32 %v1744_v53, %v1693_v14  ;;  %v1822_v20 = vmul.f32 %v1744_v53, %v1694_v15  ;;  %v1825_v62 = vmul.f32 %v1754_v52, %v1697_v29  ;;  %v1826_v63 = vmul.f32 %v1754_v52, %v1698_v38  ;;  %v1668_v15 = vld [vmem:[#allocation5 + $0xa0] sm:$0xff] }
 0x481   : > { %v1707_v52 = vadd.f32 %v3966_v9, %v1663_v25  ;;  %v1675_v25 = vld [vmem:[#allocation5 + $0xf8] sm:$0xff] }
 0x483   : > { %v1759_v27 = vpop.permute.xlu1 %1758  ;;  %v1749_v31 = vpop.permute.xlu0 %1748 }
 0x484   : > { %v1823_v21 = vmul.f32 %v1749_v31, %v1695_v46  ;;  %v1824_v2 = vmul.f32 %v1749_v31, %v1696_v47  ;;  %v1827_v45 = vmul.f32 %v1759_v27, %v1699_v48  ;;  %v1828_v13 = vmul.f32 %v1759_v27, %v1700_v57 }
 0x485   : > { %v1708_v27 = vadd.f32 %v3970_v41, %v1664_v6  ;;  %v1711_v57 = vadd.f32 %v3966_v9, %v1667_v35  ;;  %v1676_v6 = vld [vmem:[#allocation5 + $0xc0] sm:$0xff] }
 0x487   : > { %v3945_v3 = vpop.permute.xlu1 %1768  ;;  %v3947_v7 = vpop.permute.xlu0 %1763 }
 0x488   : > { %v1831_v40 = vmul.f32 %v3945_v3, %v1703_v44  ;;  %v1832_v19 = vmul.f32 %v3945_v3, %v1704_v61  ;;  %v1829_v37 = vmul.f32 %v3947_v7, %v1701_v51  ;;  %v1830_v14 = vmul.f32 %v3947_v7, %v1702_v56 }
 0x489   : > { %v1712_v7 = vadd.f32 %v3970_v41, %v1668_v15  ;;  %v1678_v15 = vld [vmem:[#allocation5] sm:$0xff] }
 0x48b   : > { %v3949_v10 = vpop.permute.xlu1 %1778  ;;  %v3951_v4 = vpop.permute.xlu0 %1773 }
 0x48c   : > { %v1833_v24 = vmul.f32 %v3951_v4, %v1705_v30  ;;  %v1834_v54 = vmul.f32 %v3951_v4, %v1706_v1  ;;  %v1716_v4 = vadd.f32 %v3970_v41, %v1672_v60  ;;  %v1679_v30 = vld [vmem:[#allocation5 + $0x28] sm:$0xff] }
 0x48f   : > { %v3953_v16 = vpop.permute.xlu1 %1788  ;;  %v3955_v22 = vpop.permute.xlu0 %1783 }
 0x493   : > { %v3960_v23 = vpop.permute.xlu1 %1798  ;;  %v3962_v8 = vpop.permute.xlu0 %1793 }
 0x494   : > { %v1844_v35 = vmul.f32 %v3960_v23, %v1716_v4 }
 0x497   : > { %v3972_v33 = vpop.permute.xlu1 %1808  ;;  %v3974_v59 = vpop.permute.xlu0 %1803 }
 0x49b   : > { %v3980_v34 = vpop.permute.xlu1 %1818  ;;  %v3982_v36 = vpop.permute.xlu0 %1813 }
 0x49f   : > { %v1877_v0 = vpop.permute.xlu1 %1876  ;;  %v1872_v42 = vpop.permute.xlu0 %1871 }
 0x4a0   : > { %v1951_v11 = vadd.f32 %v1877_v0, %v1823_v21  ;;  %v1952_v5 = vadd.f32 %v1877_v0, %v1824_v2  ;;  %v1949_v55 = vadd.f32 %v1872_v42, %v1821_v58  ;;  %v1950_v43 = vadd.f32 %v1872_v42, %v1822_v20  ;;  %v1671_v20 = vld [vmem:[#allocation5 + $0x20] sm:$0xff]  ;;  %v1669_v0 = vld [vmem:[#allocation5 + $0xd8] sm:$0xff]  ;;  %v1670_v42 = vld [vmem:[#allocation5 + $0x30] sm:$0xff] }
 0x4a1   : > { %v1710_v58 = vadd.f32 %v3970_v41, %v1666_v18  ;;  %v1835_v21 = vmul.f32 %v3949_v10, %v1707_v52  ;;  %v1836_v2 = vmul.f32 %v3949_v10, %v1708_v27  ;;  %v1715_v61 = vadd.f32 %v3966_v9, %v1671_v20 }
 0x4a2   : > { %1983 = vst [vmem:[%s3202_s21 + $0x10] sm:$0xff] %v1951_v11  ;;  %1984 = vst [vmem:[%s3202_s21 + $0x18] sm:$0xff] %v1952_v5  ;;  %v1713_v51 = vadd.f32 %v3966_v9, %v1669_v0  ;;  %v1714_v56 = vadd.f32 %v3970_v41, %v1670_v42  ;;  %v1717_v52 = vadd.f32 %v3966_v9, %v1673_v26 }
 0x4a3   : > { %1981 = vst [vmem:[%s3202_s21] sm:$0xff] %v1949_v55  ;;  %1982 = vst [vmem:[%s3202_s21 + $0x8] sm:$0xff] %v1950_v43  ;;  %v1887_v28 = vpop.permute.xlu1 %1886  ;;  %v1882_v32 = vpop.permute.xlu0 %1881  ;;  %v1718_v27 = vadd.f32 %v3970_v41, %v1674_v17  ;;  %v1843_v1 = vmul.f32 %v3960_v23, %v1715_v61 }
 0x4a4   : > { %v1955_v12 = vadd.f32 %v1887_v28, %v1827_v45  ;;  %v1956_v53 = vadd.f32 %v1887_v28, %v1828_v13  ;;  %v1953_v31 = vadd.f32 %v1882_v32, %v1825_v62  ;;  %v1954_v39 = vadd.f32 %v1882_v32, %v1826_v63 }
 0x4a5   : > { %v1839_v62 = vmul.f32 %v3953_v16, %v1711_v57  ;;  %v1840_v63 = vmul.f32 %v3953_v16, %v1712_v7  ;;  %v1837_v45 = vmul.f32 %v3955_v22, %v1709_v49  ;;  %v1838_v13 = vmul.f32 %v3955_v22, %v1710_v58 }
 0x4a6   : > { %1987 = vst [vmem:[%s3202_s21 + $0x30] sm:$0xff] %v1955_v12  ;;  %1988 = vst [vmem:[%s3202_s21 + $0x38] sm:$0xff] %v1956_v53  ;;  %v1720_v22 = vadd.f32 %v3970_v41, %v1676_v6  ;;  %v1845_v49 = vmul.f32 %v3974_v59, %v1717_v52  ;;  %v1846_v58 = vmul.f32 %v3974_v59, %v1718_v27 }
 0x4a7   : > { %1985 = vst [vmem:[%s3202_s21 + $0x20] sm:$0xff] %v1953_v31  ;;  %1986 = vst [vmem:[%s3202_s21 + $0x28] sm:$0xff] %v1954_v39  ;;  %v1897_v46 = vpop.permute.xlu1 %1896  ;;  %v1892_v47 = vpop.permute.xlu0 %1891  ;;  %v1719_v39 = vadd.f32 %v3966_v9, %v1675_v25 }
 0x4a8   : > { %v1959_v29 = vadd.f32 %v1897_v46, %v1831_v40  ;;  %v1960_v38 = vadd.f32 %v1897_v46, %v1832_v19  ;;  %v1957_v48 = vadd.f32 %v1892_v47, %v1829_v37  ;;  %v1958_v3 = vadd.f32 %v1892_v47, %v1830_v14  ;;  %v1680_v37 = vld [vmem:[#allocation5 + $0x98] sm:$0xff] }
 0x4a9   : > { %v1841_v40 = vmul.f32 %v3962_v8, %v1713_v51  ;;  %v1842_v19 = vmul.f32 %v3962_v8, %v1714_v56  ;;  %v1677_v14 = vld [vmem:[#allocation5 + $0xb8] sm:$0xff]  ;;  %v1724_v8 = vadd.f32 %v3970_v41, %v1680_v37  ;;  %v1847_v57 = vmul.f32 %v3972_v33, %v1719_v39 }
 0x4aa   : > { %1991 = vst [vmem:[%s3202_s21 + $0x50] sm:$0xff] %v1959_v29  ;;  %1992 = vst [vmem:[%s3202_s21 + $0x58] sm:$0xff] %v1960_v38  ;;  %v1723_v38 = vadd.f32 %v3966_v9, %v1679_v30  ;;  %v1848_v7 = vmul.f32 %v3972_v33, %v1720_v22 }
 0x4ab   : > { %1989 = vst [vmem:[%s3202_s21 + $0x40] sm:$0xff] %v1957_v48  ;;  %1990 = vst [vmem:[%s3202_s21 + $0x48] sm:$0xff] %v1958_v3  ;;  %v1907_v11 = vpop.permute.xlu1 %1906  ;;  %v1902_v5 = vpop.permute.xlu0 %1901  ;;  %v1721_v48 = vadd.f32 %v3966_v9, %v1677_v14  ;;  %v1722_v3 = vadd.f32 %v3970_v41, %v1678_v15  ;;  %v1852_v59 = vmul.f32 %v3980_v34, %v1724_v8 }
 0x4ac   : > { %v1963_v55 = vadd.f32 %v1907_v11, %v1835_v21  ;;  %v1964_v43 = vadd.f32 %v1907_v11, %v1836_v2  ;;  %v1961_v44 = vadd.f32 %v1902_v5, %v1833_v24  ;;  %v1962_v10 = vadd.f32 %v1902_v5, %v1834_v54 }
 0x4ad   : > { %v1851_v33 = vmul.f32 %v3980_v34, %v1723_v38  ;;  %v1849_v54 = vmul.f32 %v3982_v36, %v1721_v48  ;;  %v1850_v60 = vmul.f32 %v3982_v36, %v1722_v3 }
 0x4ae   : > { %1995 = vst [vmem:[%s3202_s21 + $0x70] sm:$0xff] %v1963_v55  ;;  %1996 = vst [vmem:[%s3202_s21 + $0x78] sm:$0xff] %v1964_v43 }
 0x4af   : > { %1993 = vst [vmem:[%s3202_s21 + $0x60] sm:$0xff] %v1961_v44  ;;  %1994 = vst [vmem:[%s3202_s21 + $0x68] sm:$0xff] %v1962_v10  ;;  %v1917_v28 = vpop.permute.xlu1 %1916  ;;  %v1912_v32 = vpop.permute.xlu0 %1911 }
 0x4b0   : > { %v1967_v12 = vadd.f32 %v1917_v28, %v1839_v62  ;;  %v1968_v53 = vadd.f32 %v1917_v28, %v1840_v63  ;;  %v1965_v31 = vadd.f32 %v1912_v32, %v1837_v45  ;;  %v1966_v16 = vadd.f32 %v1912_v32, %v1838_v13 }
 0x4b2   : > { %1999 = vst [vmem:[%s3202_s21 + $0x90] sm:$0xff] %v1967_v12  ;;  %2000 = vst [vmem:[%s3202_s21 + $0x98] sm:$0xff] %v1968_v53 }
 0x4b3   : > { %1997 = vst [vmem:[%s3202_s21 + $0x80] sm:$0xff] %v1965_v31  ;;  %1998 = vst [vmem:[%s3202_s21 + $0x88] sm:$0xff] %v1966_v16  ;;  %v1927_v50 = vpop.permute.xlu1 %1926  ;;  %v1922_v18 = vpop.permute.xlu0 %1921 }
 0x4b4   : > { %v1971_v46 = vadd.f32 %v1927_v50, %v1843_v1  ;;  %v1972_v47 = vadd.f32 %v1927_v50, %v1844_v35  ;;  %v1969_v23 = vadd.f32 %v1922_v18, %v1841_v40  ;;  %v1970_v29 = vadd.f32 %v1922_v18, %v1842_v19 }
 0x4b6   : > { %2003 = vst [vmem:[%s3202_s21 + $0xb0] sm:$0xff] %v1971_v46  ;;  %2004 = vst [vmem:[%s3202_s21 + $0xb8] sm:$0xff] %v1972_v47 }
 0x4b7   : > { %2001 = vst [vmem:[%s3202_s21 + $0xa0] sm:$0xff] %v1969_v23  ;;  %2002 = vst [vmem:[%s3202_s21 + $0xa8] sm:$0xff] %v1970_v29  ;;  %v1937_v20 = vpop.permute.xlu1 %1936  ;;  %v1932_v9 = vpop.permute.xlu0 %1931 }
 0x4b8   : > { %v1975_v21 = vadd.f32 %v1937_v20, %v1847_v57  ;;  %v1976_v41 = vadd.f32 %v1937_v20, %v1848_v7  ;;  %v1973_v2 = vadd.f32 %v1932_v9, %v1845_v49  ;;  %v1974_v24 = vadd.f32 %v1932_v9, %v1846_v58 }
 0x4ba   : > { %2007 = vst [vmem:[%s3202_s21 + $0xd0] sm:$0xff] %v1975_v21  ;;  %2008 = vst [vmem:[%s3202_s21 + $0xd8] sm:$0xff] %v1976_v41 }
 0x4bb   : > { %2005 = vst [vmem:[%s3202_s21 + $0xc0] sm:$0xff] %v1973_v2  ;;  %2006 = vst [vmem:[%s3202_s21 + $0xc8] sm:$0xff] %v1974_v24  ;;  %v1947_v0 = vpop.permute.xlu1 %1946  ;;  %v1942_v42 = vpop.permute.xlu0 %1941 }
 0x4bc   : > { %v1979_v11 = vadd.f32 %v1947_v0, %v1851_v33  ;;  %v1980_v5 = vadd.f32 %v1947_v0, %v1852_v59  ;;  %v1977_v55 = vadd.f32 %v1942_v42, %v1849_v54  ;;  %v1978_v43 = vadd.f32 %v1942_v42, %v1850_v60 }
 0x4be   : > { %2011 = vst [vmem:[%s3202_s21 + $0xf0] sm:$0xff] %v1979_v11  ;;  %2012 = vst [vmem:[%s3202_s21 + $0xf8] sm:$0xff] %v1980_v5 }
 0x4bf   : > { %2009 = vst [vmem:[%s3202_s21 + $0xe0] sm:$0xff] %v1977_v55  ;;  %2010 = vst [vmem:[%s3202_s21 + $0xe8] sm:$0xff] %v1978_v43 }
 0x4c0 PF: > { %s4310_s16 = sld [smem:[#allocation28_spill]]  ;;  %s2059_s0 = sshll.u32 %s3200_s24, 4  ;;  %s4081_s0 = int_to_ptr.vmem [resolvable:$true] %s2059_s0 }
 0x4c1   : > { %s4311_s26 = sld [smem:[#allocation29_spill]]  ;;  %s4085_s18 = scalar_lea.sflag [#allocation16], %s370_s15 }
 0x4c2   : > { %s4312_s30 = sld [smem:[#allocation43_spill]]  ;;  %s2652_s5 = scalar_lea.vmem %s4081_s0, 4096 }
 0x4c3   : > { %p2653_p6 = scmp.ne.s32.totalorder %s4081_s0, %s2652_s5  ;;  %s2875_s17 = smov [#allocation15]  }
 0x4c4   : > { %s2656_s10 = sshll.u32 %s2875_s17, 4  ;;  %s2657_s10 = int_to_ptr.vmem [resolvable:$false] %s2656_s10 }
 0x4c5   : > { %p2654_p10 = pnand %p2653_p6, %p3100_p12  ;;  %p2659_p9 = scmp.lt.s32.totalorder %s4081_s0, %s2657_s10 }
 0x4c6   : > { %s2325_s22 = sshll.u32 %s4310_s16, 1  ;;  %s2658_s16 = scalar_lea.vmem %s2657_s10, 8192 }
 0x4c7   : > { %s2343_s19 = sshll.u32 %s4311_s26, 6  ;;  %p2655_p0 = pneg %p2654_p10 }
 0x4c8   : > { %s4070_s23 = sadd.s32 %s2343_s19, %s2325_s22  ;;  %s4313_s7 = smov %s4312_s30 }
 0x4c9   : > { %s2327_s29 = sshll.u32 %s4070_s23, 7  ;;  %p2660_p13 = scmp.lt.s32.totalorder %s2658_s16, %s2652_s5 }
 0x4ca   : > { %s4078_s6 = scalar_lea.hbm %s4312_s30, %s2327_s29 }
 0x4cb   : > { %p2661_p4 = por %p2660_p13, %p2659_p9 }
 0x4cd   : > { %p2662_p2 = pnand %p2661_p4, %p2655_p0 }
 0x4cf   : > { %2665 = shalt.err (!%p2662_p2)
}
 0x4d0   : > { %s2666_s20 = scalar_lea.hbm %s4078_s6, 4096  ;;  %s2670_s22 = scalar_lea.hbm %s4313_s7, 24576 }
 0x4d1   : > { %p2667_p3 = scmp.ne.s32.totalorder %s4078_s6, %s2666_s20  ;;  %p2671_p8 = scmp.lt.s32.totalorder %s4078_s6, %s4313_s7 }
 0x4d2   : > { %p2672_p1 = scmp.lt.s32.totalorder %s2670_s22, %s2666_s20 }
 0x4d3   : > { %p2668_p7 = pnand %p2667_p3, %p3100_p12 }
 0x4d4   : > { %p2673_p6 = por %p2672_p1, %p2671_p8 }
 0x4d5   : > { %p2669_p5 = pneg %p2668_p7 }
 0x4d7   : > { %p2674_p10 = pnand %p2673_p6, %p2669_p5 }
 0x4d9   : > { %2677 = shalt.err (!%p2674_p10)
}
 0x4da   : > { %s2876_s11 = smov 256   ;;  %s2877_s30 = smov 512  }
 0x4db   : > { %s2878_s5 = smov 16   ;;  %s4314_s16 = sld [smem:[#allocation42_spill]] }
 0x4dc   : > { %2356 = dma.vmem_to_hbm [thread:$0]  (%p3100_p12), %s4081_s0, 4096, %s4078_s6, %s4085_s18, %s2876_s11, %s2877_s30, %s2878_s5  }
 0x4dd   : > { %s2040_s15 = sshll.u32 %s3198_s13, 4  ;;  %s2346_s24 = sshll.u32 %s4311_s26, 12  ;;  %s4119_s15 = int_to_ptr.vmem [resolvable:$true] %s2040_s15 }
 0x4de   : > { %s2014_s22 = scalar_lea.sflag [#allocation8], %s431_s27  ;;  %s2678_s19 = scalar_lea.vmem %s4119_s15, 4096 }
 0x4df   : > { %p2679_p0 = scmp.ne.s32.totalorder %s4119_s15, %s2678_s19  ;;  %s2879_s23 = smov [#allocation14]  }
 0x4e0   : > { %s2682_s6 = sshll.u32 %s2879_s23, 4  ;;  %s2683_s6 = int_to_ptr.vmem [resolvable:$false] %s2682_s6 }
 0x4e1   : > { %s4116_s20 = scalar_lea.hbm %s4314_s16, %s2327_s29  ;;  %p2680_p9 = pnand %p2679_p0, %p3100_p12 }
 0x4e2   : > { %s2684_s0 = scalar_lea.vmem %s2683_s6, 8192  ;;  %p2685_p4 = scmp.lt.s32.totalorder %s4119_s15, %s2683_s6 }
 0x4e3   : > { %p2681_p13 = pneg %p2680_p9  ;;  %p2686_p2 = scmp.lt.s32.totalorder %s2684_s0, %s2678_s19 }
 0x4e5   : > { %p2687_p3 = por %p2686_p2, %p2685_p4 }
 0x4e7   : > { %p2688_p7 = pnand %p2687_p3, %p2681_p13 }
 0x4e9   : > { %2691 = shalt.err (!%p2688_p7)
}
 0x4ea   : > { %s2692_s13 = scalar_lea.hbm %s4116_s20, 4096  ;;  %s2696_s9 = scalar_lea.hbm %s4314_s16, 24576 }
 0x4eb   : > { %p2693_p5 = scmp.ne.s32.totalorder %s4116_s20, %s2692_s13  ;;  %p2697_p6 = scmp.lt.s32.totalorder %s4116_s20, %s4314_s16 }
 0x4ec   : > { %p2698_p10 = scmp.lt.s32.totalorder %s2696_s9, %s2692_s13 }
 0x4ed   : > { %p2694_p8 = pnand %p2693_p5, %p3100_p12 }
 0x4ee   : > { %p2699_p0 = por %p2698_p10, %p2697_p6 }
 0x4ef   : > { %p2695_p1 = pneg %p2694_p8 }
 0x4f1   : > { %p2700_p9 = pnand %p2699_p0, %p2695_p1 }
 0x4f3   : > { %2703 = shalt.err (!%p2700_p9)
}
 0x4f4   : > { %2355 = dma.vmem_to_hbm [thread:$0]  (%p3100_p12), %s4119_s15, 4096, %s4116_s20, %s2014_s22, %s2876_s11, %s2877_s30, %s2878_s5  }
 0x4f5   : > { %s4315_s6 = sld [smem:[#allocation44_spill]]  ;;  %s2076_s13 = sshll.u32 %s3202_s21, 4  ;;  %s2077_s13 = int_to_ptr.vmem [resolvable:$true] %s2076_s13 }
 0x4f6   : > { %s2704_s27 = scalar_lea.vmem %s2077_s13, 4096  ;;  %s2880_s1 = smov [#allocation17]  }
 0x4f7   : > { %p2705_p13 = scmp.ne.s32.totalorder %s2077_s13, %s2704_s27  ;;  %s2708_s29 = sshll.u32 %s2880_s1, 4  ;;  %s2709_s29 = int_to_ptr.vmem [resolvable:$false] %s2708_s29 }
 0x4f8   : > { %s2710_s9 = scalar_lea.vmem %s2709_s29, 8192  ;;  %p2711_p3 = scmp.lt.s32.totalorder %s2077_s13, %s2709_s29 }
 0x4f9   : > { %p2706_p4 = pnand %p2705_p13, %p3107_p11  ;;  %p2712_p7 = scmp.lt.s32.totalorder %s2710_s9, %s2704_s27 }
 0x4fb   : > { %s4152_s0 = scalar_lea.hbm %s4315_s6, %s2346_s24  ;;  %p2707_p2 = pneg %p2706_p4 }
 0x4fc   : > { %p2713_p12 = por %p2712_p7, %p2711_p3 }
 0x4fe   : > { %p2714_p5 = pnand %p2713_p12, %p2707_p2 }
 0x500   : > { %2717 = shalt.err (!%p2714_p5)
}
 0x501   : > { %s2718_s21 = scalar_lea.hbm %s4152_s0, 4096  ;;  %s2722_s20 = scalar_lea.hbm %s4315_s6, 12288 }
 0x502   : > { %p2719_p8 = scmp.ne.s32.totalorder %s4152_s0, %s2718_s21  ;;  %p2723_p10 = scmp.lt.s32.totalorder %s4152_s0, %s4315_s6 }
 0x503   : > { %p2724_p0 = scmp.lt.s32.totalorder %s2722_s20, %s2718_s21 }
 0x504   : > { %p2720_p1 = pnand %p2719_p8, %p3107_p11 }
 0x505   : > { %p2725_p9 = por %p2724_p0, %p2723_p10 }
 0x506   : > { %p2721_p6 = pneg %p2720_p1 }
 0x508   : > { %p2726_p13 = pnand %p2725_p9, %p2721_p6 }
 0x50a   : > { %2729 = shalt.err (!%p2726_p13)
}
 0x50b   : > { %2357 = dma.vmem_to_hbm [thread:$0]  (%p3107_p11), %s2077_s13, 4096, %s4152_s0, %s4085_s18, %s2876_s11, %s2876_s11, %s2878_s5  }
 0x50c PF: > { %s4316_s22 = sld [smem:[#allocation24_spill]]  ;;  %p2385_p4 = scmp.ge.s32.totalorder %s2864_s14, 2 }
 0x50d   : > { %s4317_s17 = sld [smem:[#allocation37_spill]] }
 0x512   : > { %s2091_s10 = sand.u32 1, %s4316_s22  }
 0x513   : > { %p4318_p2 = scmp.ne.s32.totalorder %s4317_s17, 0  ;;  %s2092_s19 = scalar_lea.sflag [#allocation8], %s2091_s10 }
 0x515   : > { %p2375_p3 = pnand %p2385_p4, %p4318_p2 }
 0x517   : > { %p2376_p7 = pneg %p2375_p3 }
 0x519   : > { %2799 = dma.done.wait (%p2376_p7), %s2092_s19, 4096  }
 0x51a   : > { %2801 = vsyncadd (%p2376_p7), %s2092_s19, 4294963200  ;;  %s4319_s4 = sadd.s32 4294967294, %s2864_s14  }
 0x51b   : > { %s2100_s23 = sand.u32 1, %s4319_s4  }
 0x51c   : > { %s2101_s27 = scalar_lea.sflag [#allocation16], %s2100_s23 }
 0x51d   : > { %2803 = dma.done.wait (%p2376_p7), %s2101_s27, 4096  }
 0x51e   : > { %2805 = vsyncadd (%p2376_p7), %s2101_s27, 4294963200  ;;  %s4320_s1 = sld [smem:[#allocation38_spill]] }
 0x524   : > { %p4321_p11 = scmp.ne.s32.totalorder %s4320_s1, 0 }
 0x526   : > { %p2381_p12 = pnand %p2385_p4, %p4321_p11 }
 0x528   : > { %p2382_p5 = pneg %p2381_p12 }
 0x52a   : > { %2807 = dma.done.wait (%p2382_p5), %s2101_s27, 4096  }
 0x52b   : > { %2809 = vsyncadd (%p2382_p5), %s2101_s27, 4294963200  ;;  %s33_s14 = sadd.s32 1, %s2864_s14   ;;  %s4323_s11 = sld [smem:[#allocation25_spill]] }
 0x52c   : > { %p4184_p8 = scmp.ge.s32.totalorder %s33_s14, 8   ;;  %s4324_s26 = sld [smem:[#allocation36_spill]] }
 0x52d   : > { %s4325_s5 = sld [smem:[#allocation26_spill]]  ;;  %s4332_s24 = smov %s2816_s25 }
 0x52e   : > { %s4326_s29 = sld [smem:[#allocation34_spill]]  ;;  %s4334_s27 = smov %s2828_s28 }
 0x52f   : > { %s4327_s0 = sld [smem:[#allocation27_spill]]  ;;  %s4336_s30 = smov %s2840_s8 }
 0x530   : > { %s4328_s9 = sld [smem:[#allocation35_spill]]  ;;  %s4338_s10 = smov %s2856_s12 }
 0x531   : > { %s4329_s13 = sld [smem:[#allocation30_spill]]  ;;  %s4333_s25 = smov %s4323_s11 }
 0x532   : > { %s4330_s21 = sld [smem:[#allocation31_spill]] }
 0x533   : > { %s4331_s20 = sld [smem:[#allocation33_spill]]  ;;  %s4335_s28 = smov %s4325_s5 }
 0x535   : > { %s4337_s8 = smov %s4327_s0  ;;  %32 = sbr.rel (!%p4184_p8) target bundleno = 23 (0x17), region = 162 }
 0x537   : > { %s4339_s11 = smov %s4329_s13 }
 0x538   : > { %s4340_s12 = smov %s4330_s21 }
 0x539   : > { %s4341_s13 = smov %s4331_s20 }
 0x53a   :  { %2115 = vsyncpa [#allocation7], 1 }
 0x53b   :  { %2117 = vsyncpa [#allocation7 + $0x1], 1 }
 0x53c   :  { %2118 = vsyncpa [#allocation10], 1 }
 0x53d   :  { %2120 = vsyncpa [#allocation10 + $0x1], 1 }
 0x53e   :  { %2121 = vsyncpa [#allocation13], 1 }
 0x53f   :  { %2123 = vsyncpa [#allocation13 + $0x1], 1 }
 0x540   :  { %2124 = vsyncpa [#allocation8], 1 }
 0x541   :  { %2126 = vsyncpa [#allocation8 + $0x1], 1 }
 0x542   :  { %2127 = vsyncpa [#allocation16], 1 }
 0x543   :  { %2129 = vsyncpa [#allocation16 + $0x1], 1 }

</bundles_post_ra>
